<compile_context>
chip_gen: v7x
topology: tpu7x:2x2x1
jax: 0.10.0
libtpu: 0.0.40
codegen_flags: <defaults>
</compile_context>

<pallas_src>
from functools import partial

import jax
import jax.numpy as jnp
from jax.experimental import pallas as pl
from jax.experimental.pallas import tpu as pltpu


def complete_model_kernel(xseq_ref, lbig_ref, wxf_ref, thf_ref, bf_ref, wc_ref,
                          xcol_ref, alive_ref, r_ref,
                          wg_ref, bg_ref, w1a_ref, w1b_ref, w1c_ref, b1_ref,
                          w2_ref, b2_ref, w3_ref, b3_ref, wfc_ref, bfc_ref,
                          out_ref):
    T, NB, _ = xseq_ref.shape
    N = out_ref.shape[0]
    B = NB // N
    Hd = w1a_ref.shape[0]
    MN, BCS = xcol_ref.shape
    MAXC = MN // N
    CS = BCS // B
    S = r_ref.shape[1]
    f32 = jnp.float32

    # ------------- Part 1: GC-LSTM (ChebConv K=2) over the lookback --------
    # Node-state rows are batch-major: row = b*N + n.  lbig = kron(I_B, L_hat).
    lbig = lbig_ref[...]                      # (NB, NB) block-diagonal graph op
    thf = thf_ref[...]                        # (2Hd, 4Hd) = [theta0; theta1], gates i|f|c|o
    wci = wc_ref[0]                           # (1, Hd) peephole weights
    wcf = wc_ref[1]
    wco = wc_ref[2]

    # Input + bias term hoisted out of the recurrent chain (computed once).
    xwb = xseq_ref[...] * wxf_ref[...][None] + bf_ref[...][None]      # (T, NB, 4Hd)

    H = jnp.zeros((NB, Hd), f32)
    C = jnp.zeros((NB, Hd), f32)
    for t in range(T):                        # static unroll: lookback is small & fixed
        LH = jnp.dot(lbig, H, preferred_element_type=f32)             # graph op: 1 MXU push
        g = jnp.dot(jnp.concatenate([H, LH], axis=1), thf,
                    preferred_element_type=f32) + xwb[t]              # all 4 gates: 1 MXU push
        I = jax.nn.sigmoid(g[:, 0:Hd] + wci * C)
        F = jax.nn.sigmoid(g[:, Hd:2 * Hd] + wcf * C)
        Gc = jnp.tanh(g[:, 2 * Hd:3 * Hd])
        C = F * C + I * Gc
        O = jax.nn.sigmoid(g[:, 3 * Hd:4 * Hd] + wco * C)
        H = O * jnp.tanh(C)
    # hidden_intensity[b, n, :] == H[b*N + n, :]  (stays in VMEM / vregs)

    # ------------- Part 2: autoregressive LSTM + regressor head ------------
    # Head rows are contract-slot-major: mi = i*N + n.
    wg = wg_ref[...]                          # (CS+Hd, 4Hd) = [W_ih; W_hh]
    bg = bg_ref[...]                          # (1, 4Hd)
    w1a = w1a_ref[...]                        # (Hd, RH)  lstm_last part of regressor W1
    w1c = w1c_ref[...]                        # (1, RH)   r part of regressor W1
    w2 = w2_ref[...]; b2 = b2_ref[...]
    w3 = w3_ref[...]; b3 = b3_ref[...]
    wfc = wfc_ref[...]; bfc = bfc_ref[...]
    alive = alive_ref[...]                    # (MN, 1) prefix-AND "break" mask

    # j-invariant hidden_intensity projection: project on (NB, Hd), fold b1,
    # then tile per LSTM seq row s to MN head rows (once, outside the j loop).
    hiproj = jnp.dot(H, w1b_ref[...], preferred_element_type=f32) + b1_ref[...]   # (NB, RH)
    his_t = []
    for s in range(B):
        hip_s = hiproj[s * N:(s + 1) * N, :]                          # (N, RH)
        his_t.append(jnp.concatenate([hip_s] * MAXC, axis=0))         # (MN, RH)

    xcol = xcol_ref[...]                      # (MN, B*CS): batch column T-1 of each contract
    col = [xcol[:, s * CS:(s + 1) * CS] for s in range(B)]

    for j in range(S):                        # static unroll: steps_ahead
        # torch calls self.lstm(contract) with no hidden state -> zero init.
        h = jnp.zeros((MN, Hd), f32)
        c = jnp.zeros((MN, Hd), f32)
        newcol = [None] * B
        for s in range(B):                    # static unroll: LSTM seq axis (== B)
            xs = col[s]                       # (MN, CS)
            g = jnp.dot(jnp.concatenate([xs, h], axis=1), wg,
                        preferred_element_type=f32) + bg              # fused gates: 1 MXU push
            ig = jax.nn.sigmoid(g[:, 0:Hd])
            fg = jax.nn.sigmoid(g[:, Hd:2 * Hd])
            gg = jnp.tanh(g[:, 2 * Hd:3 * Hd])
            og = jax.nn.sigmoid(g[:, 3 * Hd:4 * Hd])
            c = fg * c + ig * gg
            h = og * jnp.tanh(c)

            # Regressor head; feature concat replaced by pre-split W1 parts.
            rj = r_ref[s:s + 1, j:j + 1]                               # (1, 1)
            z1 = jnp.maximum(jnp.dot(h, w1a, preferred_element_type=f32)
                             + his_t[s] + rj * w1c, 0.0)               # (MN, RH)
            z2 = jnp.maximum(jnp.dot(z1, w2, preferred_element_type=f32) + b2, 0.0)
            predv = jnp.dot(z2, w3, preferred_element_type=f32) + b3   # (MN, CS)
            contrib = (jnp.dot(jnp.maximum(predv, 0.0), wfc,
                               preferred_element_type=f32) + bfc) * alive   # (MN, 1)
            nodec = contrib[0:N, :]
            for i in range(1, MAXC):          # sum contributions over contract slots
                nodec = nodec + contrib[i * N:(i + 1) * N, :]
            out_ref[:, s * S + j:s * S + j + 1] = nodec                # store as produced
            newcol[s] = predv                 # autoregressive feedback (pre-ReLU)
        col = newcol


@partial(jax.jit, static_argnames=("contract_size",))
def complete_model_forward(x_nodes, ahat, gc_params, x, r, head_params,
                           contract_size):
    gc_wx, gc_th0, gc_th1, gc_cb, gc_wc, gc_b = gc_params
    (w_ih, w_hh, b_ih, b_hh, w1, b1, w2, b2, w3, b3, wfc, bfc) = head_params

    T, NB, _ = x_nodes.shape
    N = ahat.shape[0]
    B = NB // N
    Hd = gc_wx.shape[-1]
    _, Tx, _, D = x.shape
    CS = contract_size
    MAXC = D // CS
    S = r.shape[1]
    MN = MAXC * N
    RH = w1.shape[0]
    RH2 = w2.shape[0]
    f32 = jnp.float32

    # ---- one-time parameter layout prep (gates fused along the lane axis) --
    th0f = jnp.concatenate([gc_th0[g] for g in range(4)], axis=1)      # (Hd, 4Hd)
    th1f = jnp.concatenate([gc_th1[g] for g in range(4)], axis=1)      # (Hd, 4Hd)
    thf = jnp.concatenate([th0f, th1f], axis=0)                        # (2Hd, 4Hd)
    wxf = jnp.concatenate([gc_wx[g] for g in range(4)], axis=1)        # (1, 4Hd)
    bf = jnp.concatenate([gc_cb[g] + gc_b[g] for g in range(4)], axis=1)   # (1, 4Hd)
    # Batched graph operator (block-diagonal) -> one MXU op per timestep.
    lbig = jnp.kron(jnp.eye(B, dtype=f32), ahat.astype(f32))           # (NB, NB)

    wg = jnp.concatenate([w_ih.T, w_hh.T], axis=0)                     # (CS+Hd, 4Hd)
    bg = (b_ih + b_hh).reshape(1, -1)
    w1t = w1.T                                                         # (2Hd+1, RH)
    w1a = w1t[0:Hd, :]
    w1b = w1t[Hd:2 * Hd, :]
    w1c = w1t[2 * Hd:2 * Hd + 1, :]

    # ---- head inputs: only the consumed columns + the "break" mask ---------
    # nn.LSTM (batch_first=False) on the (B, T, CS) contract only ever exposes
    # batch column T-1 to the output, so only that column is shipped.
    xcol = (x[:, Tx - 1, :, :].reshape(B, N, MAXC, CS)
            .transpose(2, 1, 0, 3).reshape(MN, B * CS))                # rows mi = i*N + n
    # Exact PyTorch break test: slot alive iff it AND every preceding slot of
    # that node has any nonzero element over the full (B, T, CS) slab.
    amax = jnp.max(jnp.abs(x.reshape(B, Tx, N, MAXC, CS)), axis=(0, 1, 4))   # (N, MAXC)
    alive = jnp.cumprod((amax > 0.0).astype(f32), axis=1)              # prefix-AND over slots
    alive = alive.T.reshape(MN, 1)

    flops = (T * (2 * NB * NB * Hd + 2 * NB * 2 * Hd * 4 * Hd + 16 * NB * Hd)
             + 2 * NB * Hd * RH
             + S * B * MN * 2 * ((CS + Hd) * 4 * Hd + Hd * RH + RH * RH2
                                 + RH2 * CS + CS))
    cost = pl.CostEstimate(
        flops=int(flops),
        transcendentals=int(T * 5 * NB * Hd + S * B * 5 * MN * Hd),
        bytes_accessed=int(4 * (x_nodes.size + lbig.size + thf.size + wxf.size
                                + bf.size + gc_wc.size + xcol.size + alive.size
                                + r.size + wg.size + w1.size + w2.size + w3.size
                                + wfc.size + N * B * S)))

    # Everything fits trivially in VMEM at these latency-bound sizes: whole-
    # array VMEM residency, no grid.
    # TODO(synk): if N/MAXC/B scale up, add a parallel grid axis over head rows
    # (multiple of 8) for the 2 TensorCores on v7x and BlockSpec row tiling.
    vmem = pl.BlockSpec(memory_space=pltpu.MemorySpace.VMEM)
    out_nm = pl.pallas_call(
        complete_model_kernel,
        out_shape=jax.ShapeDtypeStruct((N, B * S), f32),
        in_specs=[vmem] * 21,
        out_specs=vmem,
        compiler_params=pltpu.CompilerParams(vmem_limit_bytes=32 * 1024 * 1024),
        cost_estimate=cost,
    )(x_nodes.astype(f32), lbig, wxf, thf, bf, gc_wc,
      xcol, alive, r.astype(f32),
      wg, bg, w1a, w1b, w1c, b1.reshape(1, -1),
      w2.T, b2.reshape(1, -1), w3.T, b3.reshape(1, -1),
      wfc.T, bfc.reshape(1, -1))
    return out_nm.reshape(N, B, S).transpose(1, 0, 2)                  # (B, N, steps_ahead)


if __name__ == "__main__":
    # config (mirrors `args`)
    B, T, N = 2, 4, 4                 # batch_size, lookback, num_nodes
    HD, RH, RH2 = 8, 16, 8            # lstm_hidden_size, regressor_hidden_size(_2)
    CS, MAXC, S = 4, 2, 3             # contract_size, max contracts, steps_ahead

    key = jax.random.PRNGKey(0)
    ks = jax.random.split(key, 24)
    nrm = lambda k, sh, s=0.3: (s * jax.random.normal(k, sh)).astype(jnp.float32)

    # ---- GC-LSTM (graph) parameters (in_channels=1, out=HD, K=2) ----------
    gc_wx = nrm(ks[0], (4, 1, HD))        # W_i / W_f / W_c / W_o
    gc_th0 = nrm(ks[1], (4, HD, HD))      # ChebConv theta_0 per gate (i,f,c,o)
    gc_th1 = nrm(ks[2], (4, HD, HD))      # ChebConv theta_1 per gate
    gc_cb = nrm(ks[3], (4, 1, HD))        # ChebConv bias per gate
    gc_wc = nrm(ks[4], (3, 1, HD))        # w_c_i / w_c_f / w_c_o (peepholes)
    gc_b = nrm(ks[5], (4, 1, HD))         # b_i / b_f / b_c / b_o
    gc_params = (gc_wx, gc_th0, gc_th1, gc_cb, gc_wc, gc_b)

    # ---- LSTM + regressor + fc parameters (torch layouts; transposed in wrapper)
    w_ih = nrm(ks[6], (4 * HD, CS)); w_hh = nrm(ks[7], (4 * HD, HD))
    b_ih = nrm(ks[8], (4 * HD,));    b_hh = nrm(ks[9], (4 * HD,))
    w1 = nrm(ks[10], (RH, 2 * HD + 1)); b1 = nrm(ks[11], (RH,))
    w2 = nrm(ks[12], (RH2, RH));        b2 = nrm(ks[13], (RH2,))
    w3 = nrm(ks[14], (CS, RH2));        b3 = nrm(ks[15], (CS,))
    wfc = nrm(ks[16], (1, CS));         bfc = nrm(ks[17], (1,))
    head_params = (w_ih, w_hh, b_ih, b_hh, w1, b1, w2, b2, w3, b3, wfc, bfc)

    # ---- inputs ------------------------------------------------------------
    x_nodes = nrm(ks[18], (T, B * N, 1), 1.0)     # InputList[t].x stacked (rows b*N+n)
    x = nrm(ks[19], (B, T, N, MAXC * CS), 1.0)    # contract tensor
    x = x.at[:, :, 2, CS:2 * CS].set(0.0)         # node 2: 2nd contract empty -> break at i=1
    x = x.at[:, :, 3, :].set(0.0)                 # node 3: no contracts -> immediate break
    r = nrm(ks[20], (B, S), 1.0)                  # conditioning

    # undirected ring graph; shared L_hat = -D^{-1/2} A D^{-1/2} (ChebConv,
    # K=2, sym normalization, lambda_max=2)
    idx = jnp.arange(N)
    A = jnp.zeros((N, N), jnp.float32)
    A = A.at[idx, (idx + 1) % N].set(1.0)
    A = A.at[(idx + 1) % N, idx].set(1.0)
    deg = A.sum(axis=1)
    dinv = jnp.where(deg > 0, 1.0 / jnp.sqrt(deg), 0.0)
    ahat = -(dinv[:, None] * A * dinv[None, :])   # (N, N)

    pred = complete_model_forward(x_nodes, ahat, gc_params, x, r, head_params,
                                  contract_size=CS)
    pred = jax.block_until_ready(pred)            # (B, N, steps_ahead)

    assert pred.shape == (B, N, S)
    assert bool(jnp.all(jnp.isfinite(pred)))
    print("KERNEL_OK")
</pallas_src>

<mosaic_0001>
module attributes {stable_mosaic.version = 11 : i64} {
  func.func @complete_model_kernel(%arg0: memref<4x8x1xf32, #tpu.memory_space<vmem>>, %arg1: memref<8x8xf32, #tpu.memory_space<vmem>>, %arg2: memref<1x32xf32, #tpu.memory_space<vmem>>, %arg3: memref<16x32xf32, #tpu.memory_space<vmem>>, %arg4: memref<1x32xf32, #tpu.memory_space<vmem>>, %arg5: memref<3x1x8xf32, #tpu.memory_space<vmem>>, %arg6: memref<8x8xf32, #tpu.memory_space<vmem>>, %arg7: memref<8x1xf32, #tpu.memory_space<vmem>>, %arg8: memref<2x3xf32, #tpu.memory_space<vmem>>, %arg9: memref<12x32xf32, #tpu.memory_space<vmem>>, %arg10: memref<1x32xf32, #tpu.memory_space<vmem>>, %arg11: memref<8x16xf32, #tpu.memory_space<vmem>>, %arg12: memref<8x16xf32, #tpu.memory_space<vmem>>, %arg13: memref<1x16xf32, #tpu.memory_space<vmem>>, %arg14: memref<1x16xf32, #tpu.memory_space<vmem>>, %arg15: memref<16x8xf32, #tpu.memory_space<vmem>>, %arg16: memref<1x8xf32, #tpu.memory_space<vmem>>, %arg17: memref<8x4xf32, #tpu.memory_space<vmem>>, %arg18: memref<1x4xf32, #tpu.memory_space<vmem>>, %arg19: memref<4x1xf32, #tpu.memory_space<vmem>>, %arg20: memref<1x1xf32, #tpu.memory_space<vmem>>, %arg21: memref<4x6xf32, #tpu.memory_space<vmem>>) attributes {dimension_semantics = [], scalar_prefetch = 0 : i64, scratch_operands = 0 : i64, tpu.core_type = #tpu.core_type<tc>} {
    %c0 = arith.constant 0 : index
    %c0_0 = arith.constant 0 : index
    %0 = vector.load %arg1[%c0, %c0_0] : memref<8x8xf32, #tpu.memory_space<vmem>>, vector<8x8xf32>
    %c0_1 = arith.constant 0 : index
    %c0_2 = arith.constant 0 : index
    %1 = vector.load %arg3[%c0_1, %c0_2] : memref<16x32xf32, #tpu.memory_space<vmem>>, vector<16x32xf32>
    %c0_3 = arith.constant 0 : index
    %c0_4 = arith.constant 0 : index
    %c0_5 = arith.constant 0 : index
    %2 = vector.load %arg5[%c0_3, %c0_4, %c0_5] : memref<3x1x8xf32, #tpu.memory_space<vmem>>, vector<1x1x8xf32>
    %3 = vector.shape_cast %2 : vector<1x1x8xf32> to vector<1x8xf32>
    %c1 = arith.constant 1 : index
    %c0_6 = arith.constant 0 : index
    %c0_7 = arith.constant 0 : index
    %4 = vector.load %arg5[%c1, %c0_6, %c0_7] : memref<3x1x8xf32, #tpu.memory_space<vmem>>, vector<1x1x8xf32>
    %5 = vector.shape_cast %4 : vector<1x1x8xf32> to vector<1x8xf32>
    %c2 = arith.constant 2 : index
    %c0_8 = arith.constant 0 : index
    %c0_9 = arith.constant 0 : index
    %6 = vector.load %arg5[%c2, %c0_8, %c0_9] : memref<3x1x8xf32, #tpu.memory_space<vmem>>, vector<1x1x8xf32>
    %7 = vector.shape_cast %6 : vector<1x1x8xf32> to vector<1x8xf32>
    %c0_10 = arith.constant 0 : index
    %c0_11 = arith.constant 0 : index
    %c0_12 = arith.constant 0 : index
    %8 = vector.load %arg0[%c0_10, %c0_11, %c0_12] : memref<4x8x1xf32, #tpu.memory_space<vmem>>, vector<4x8x1xf32>
    %c0_13 = arith.constant 0 : index
    %c0_14 = arith.constant 0 : index
    %9 = vector.load %arg2[%c0_13, %c0_14] : memref<1x32xf32, #tpu.memory_space<vmem>>, vector<1x32xf32>
    %10 = vector.shape_cast %9 : vector<1x32xf32> to vector<1x1x32xf32>
    %11 = vector.broadcast %8 : vector<4x8x1xf32> to vector<4x8x32xf32>
    %12 = vector.broadcast %10 : vector<1x1x32xf32> to vector<4x8x32xf32>
    %13 = arith.mulf %11, %12 : vector<4x8x32xf32>
    %c0_15 = arith.constant 0 : index
    %c0_16 = arith.constant 0 : index
    %14 = vector.load %arg4[%c0_15, %c0_16] : memref<1x32xf32, #tpu.memory_space<vmem>>, vector<1x32xf32>
    %15 = vector.shape_cast %14 : vector<1x32xf32> to vector<1x1x32xf32>
    %16 = vector.broadcast %15 : vector<1x1x32xf32> to vector<4x8x32xf32>
    %17 = arith.addf %13, %16 : vector<4x8x32xf32>
    %cst = arith.constant 0.000000e+00 : f32
    %18 = vector.broadcast %cst : f32 to vector<8x8xf32>
    %cst_17 = arith.constant 0.000000e+00 : f32
    %19 = vector.broadcast %cst_17 : f32 to vector<8x8xf32>
    %cst_18 = arith.constant dense<0.000000e+00> : vector<8x8xf32>
    %20 = tpu.matmul %0, %18, %cst_18 {dimension_numbers = #tpu.dot_dimension_numbers<[1], [0], [0], [1], [0, 0, 1, 1], [], []>} : vector<8x8xf32>, vector<8x8xf32>, vector<8x8xf32> -> vector<8x8xf32>
    %21 = tpu.concatenate %18, %20 in 1 : vector<8x8xf32>, vector<8x8xf32> -> vector<8x16xf32>
    %cst_19 = arith.constant dense<0.000000e+00> : vector<8x32xf32>
    %22 = tpu.matmul %21, %1, %cst_19 {dimension_numbers = #tpu.dot_dimension_numbers<[1], [0], [0], [1], [0, 0, 1, 1], [], []>} : vector<8x16xf32>, vector<16x32xf32>, vector<8x32xf32> -> vector<8x32xf32>
    %23 = vector.extract_strided_slice %17 {offsets = [0, 0, 0], sizes = [1, 8, 32], strides = [1, 1, 1]} : vector<4x8x32xf32> to vector<1x8x32xf32>
    %24 = vector.shape_cast %23 : vector<1x8x32xf32> to vector<8x32xf32>
    %25 = arith.addf %22, %24 : vector<8x32xf32>
    %26 = vector.extract_strided_slice %25 {offsets = [0, 0], sizes = [8, 8], strides = [1, 1]} : vector<8x32xf32> to vector<8x8xf32>
    %27 = vector.broadcast %3 : vector<1x8xf32> to vector<8x8xf32>
    %28 = arith.mulf %27, %19 : vector<8x8xf32>
    %29 = arith.addf %26, %28 : vector<8x8xf32>
    %30 = arith.negf %29 : vector<8x8xf32>
    %31 = math.exp %30 : vector<8x8xf32>
    %cst_20 = arith.constant 1.000000e+00 : f32
    %32 = vector.broadcast %cst_20 : f32 to vector<8x8xf32>
    %33 = arith.addf %32, %31 : vector<8x8xf32>
    %34 = arith.divf %32, %33 : vector<8x8xf32>
    %35 = vector.extract_strided_slice %25 {offsets = [0, 8], sizes = [8, 8], strides = [1, 1]} : vector<8x32xf32> to vector<8x8xf32>
    %36 = vector.broadcast %5 : vector<1x8xf32> to vector<8x8xf32>
    %37 = arith.mulf %36, %19 : vector<8x8xf32>
    %38 = arith.addf %35, %37 : vector<8x8xf32>
    %39 = arith.negf %38 : vector<8x8xf32>
    %40 = math.exp %39 : vector<8x8xf32>
    %cst_21 = arith.constant 1.000000e+00 : f32
    %41 = vector.broadcast %cst_21 : f32 to vector<8x8xf32>
    %42 = arith.addf %41, %40 : vector<8x8xf32>
    %43 = arith.divf %41, %42 : vector<8x8xf32>
    %44 = vector.extract_strided_slice %25 {offsets = [0, 16], sizes = [8, 8], strides = [1, 1]} : vector<8x32xf32> to vector<8x8xf32>
    %45 = math.tanh %44 : vector<8x8xf32>
    %46 = arith.mulf %43, %19 : vector<8x8xf32>
    %47 = arith.mulf %34, %45 : vector<8x8xf32>
    %48 = arith.addf %46, %47 : vector<8x8xf32>
    %49 = vector.extract_strided_slice %25 {offsets = [0, 24], sizes = [8, 8], strides = [1, 1]} : vector<8x32xf32> to vector<8x8xf32>
    %50 = vector.broadcast %7 : vector<1x8xf32> to vector<8x8xf32>
    %51 = arith.mulf %50, %48 : vector<8x8xf32>
    %52 = arith.addf %49, %51 : vector<8x8xf32>
    %53 = arith.negf %52 : vector<8x8xf32>
    %54 = math.exp %53 : vector<8x8xf32>
    %cst_22 = arith.constant 1.000000e+00 : f32
    %55 = vector.broadcast %cst_22 : f32 to vector<8x8xf32>
    %56 = arith.addf %55, %54 : vector<8x8xf32>
    %57 = arith.divf %55, %56 : vector<8x8xf32>
    %58 = math.tanh %48 : vector<8x8xf32>
    %59 = arith.mulf %57, %58 : vector<8x8xf32>
    %cst_23 = arith.constant dense<0.000000e+00> : vector<8x8xf32>
    %60 = tpu.matmul %0, %59, %cst_23 {dimension_numbers = #tpu.dot_dimension_numbers<[1], [0], [0], [1], [0, 0, 1, 1], [], []>} : vector<8x8xf32>, vector<8x8xf32>, vector<8x8xf32> -> vector<8x8xf32>
    %61 = tpu.concatenate %59, %60 in 1 : vector<8x8xf32>, vector<8x8xf32> -> vector<8x16xf32>
    %cst_24 = arith.constant dense<0.000000e+00> : vector<8x32xf32>
    %62 = tpu.matmul %61, %1, %cst_24 {dimension_numbers = #tpu.dot_dimension_numbers<[1], [0], [0], [1], [0, 0, 1, 1], [], []>} : vector<8x16xf32>, vector<16x32xf32>, vector<8x32xf32> -> vector<8x32xf32>
    %63 = vector.extract_strided_slice %17 {offsets = [1, 0, 0], sizes = [1, 8, 32], strides = [1, 1, 1]} : vector<4x8x32xf32> to vector<1x8x32xf32>
    %64 = vector.shape_cast %63 : vector<1x8x32xf32> to vector<8x32xf32>
    %65 = arith.addf %62, %64 : vector<8x32xf32>
    %66 = vector.extract_strided_slice %65 {offsets = [0, 0], sizes = [8, 8], strides = [1, 1]} : vector<8x32xf32> to vector<8x8xf32>
    %67 = vector.broadcast %3 : vector<1x8xf32> to vector<8x8xf32>
    %68 = arith.mulf %67, %48 : vector<8x8xf32>
    %69 = arith.addf %66, %68 : vector<8x8xf32>
    %70 = arith.negf %69 : vector<8x8xf32>
    %71 = math.exp %70 : vector<8x8xf32>
    %cst_25 = arith.constant 1.000000e+00 : f32
    %72 = vector.broadcast %cst_25 : f32 to vector<8x8xf32>
    %73 = arith.addf %72, %71 : vector<8x8xf32>
    %74 = arith.divf %72, %73 : vector<8x8xf32>
    %75 = vector.extract_strided_slice %65 {offsets = [0, 8], sizes = [8, 8], strides = [1, 1]} : vector<8x32xf32> to vector<8x8xf32>
    %76 = vector.broadcast %5 : vector<1x8xf32> to vector<8x8xf32>
    %77 = arith.mulf %76, %48 : vector<8x8xf32>
    %78 = arith.addf %75, %77 : vector<8x8xf32>
    %79 = arith.negf %78 : vector<8x8xf32>
    %80 = math.exp %79 : vector<8x8xf32>
    %cst_26 = arith.constant 1.000000e+00 : f32
    %81 = vector.broadcast %cst_26 : f32 to vector<8x8xf32>
    %82 = arith.addf %81, %80 : vector<8x8xf32>
    %83 = arith.divf %81, %82 : vector<8x8xf32>
    %84 = vector.extract_strided_slice %65 {offsets = [0, 16], sizes = [8, 8], strides = [1, 1]} : vector<8x32xf32> to vector<8x8xf32>
    %85 = math.tanh %84 : vector<8x8xf32>
    %86 = arith.mulf %83, %48 : vector<8x8xf32>
    %87 = arith.mulf %74, %85 : vector<8x8xf32>
    %88 = arith.addf %86, %87 : vector<8x8xf32>
    %89 = vector.extract_strided_slice %65 {offsets = [0, 24], sizes = [8, 8], strides = [1, 1]} : vector<8x32xf32> to vector<8x8xf32>
    %90 = vector.broadcast %7 : vector<1x8xf32> to vector<8x8xf32>
    %91 = arith.mulf %90, %88 : vector<8x8xf32>
    %92 = arith.addf %89, %91 : vector<8x8xf32>
    %93 = arith.negf %92 : vector<8x8xf32>
    %94 = math.exp %93 : vector<8x8xf32>
    %cst_27 = arith.constant 1.000000e+00 : f32
    %95 = vector.broadcast %cst_27 : f32 to vector<8x8xf32>
    %96 = arith.addf %95, %94 : vector<8x8xf32>
    %97 = arith.divf %95, %96 : vector<8x8xf32>
    %98 = math.tanh %88 : vector<8x8xf32>
    %99 = arith.mulf %97, %98 : vector<8x8xf32>
    %cst_28 = arith.constant dense<0.000000e+00> : vector<8x8xf32>
    %100 = tpu.matmul %0, %99, %cst_28 {dimension_numbers = #tpu.dot_dimension_numbers<[1], [0], [0], [1], [0, 0, 1, 1], [], []>} : vector<8x8xf32>, vector<8x8xf32>, vector<8x8xf32> -> vector<8x8xf32>
    %101 = tpu.concatenate %99, %100 in 1 : vector<8x8xf32>, vector<8x8xf32> -> vector<8x16xf32>
    %cst_29 = arith.constant dense<0.000000e+00> : vector<8x32xf32>
    %102 = tpu.matmul %101, %1, %cst_29 {dimension_numbers = #tpu.dot_dimension_numbers<[1], [0], [0], [1], [0, 0, 1, 1], [], []>} : vector<8x16xf32>, vector<16x32xf32>, vector<8x32xf32> -> vector<8x32xf32>
    %103 = vector.extract_strided_slice %17 {offsets = [2, 0, 0], sizes = [1, 8, 32], strides = [1, 1, 1]} : vector<4x8x32xf32> to vector<1x8x32xf32>
    %104 = vector.shape_cast %103 : vector<1x8x32xf32> to vector<8x32xf32>
    %105 = arith.addf %102, %104 : vector<8x32xf32>
    %106 = vector.extract_strided_slice %105 {offsets = [0, 0], sizes = [8, 8], strides = [1, 1]} : vector<8x32xf32> to vector<8x8xf32>
    %107 = vector.broadcast %3 : vector<1x8xf32> to vector<8x8xf32>
    %108 = arith.mulf %107, %88 : vector<8x8xf32>
    %109 = arith.addf %106, %108 : vector<8x8xf32>
    %110 = arith.negf %109 : vector<8x8xf32>
    %111 = math.exp %110 : vector<8x8xf32>
    %cst_30 = arith.constant 1.000000e+00 : f32
    %112 = vector.broadcast %cst_30 : f32 to vector<8x8xf32>
    %113 = arith.addf %112, %111 : vector<8x8xf32>
    %114 = arith.divf %112, %113 : vector<8x8xf32>
    %115 = vector.extract_strided_slice %105 {offsets = [0, 8], sizes = [8, 8], strides = [1, 1]} : vector<8x32xf32> to vector<8x8xf32>
    %116 = vector.broadcast %5 : vector<1x8xf32> to vector<8x8xf32>
    %117 = arith.mulf %116, %88 : vector<8x8xf32>
    %118 = arith.addf %115, %117 : vector<8x8xf32>
    %119 = arith.negf %118 : vector<8x8xf32>
    %120 = math.exp %119 : vector<8x8xf32>
    %cst_31 = arith.constant 1.000000e+00 : f32
    %121 = vector.broadcast %cst_31 : f32 to vector<8x8xf32>
    %122 = arith.addf %121, %120 : vector<8x8xf32>
    %123 = arith.divf %121, %122 : vector<8x8xf32>
    %124 = vector.extract_strided_slice %105 {offsets = [0, 16], sizes = [8, 8], strides = [1, 1]} : vector<8x32xf32> to vector<8x8xf32>
    %125 = math.tanh %124 : vector<8x8xf32>
    %126 = arith.mulf %123, %88 : vector<8x8xf32>
    %127 = arith.mulf %114, %125 : vector<8x8xf32>
    %128 = arith.addf %126, %127 : vector<8x8xf32>
    %129 = vector.extract_strided_slice %105 {offsets = [0, 24], sizes = [8, 8], strides = [1, 1]} : vector<8x32xf32> to vector<8x8xf32>
    %130 = vector.broadcast %7 : vector<1x8xf32> to vector<8x8xf32>
    %131 = arith.mulf %130, %128 : vector<8x8xf32>
    %132 = arith.addf %129, %131 : vector<8x8xf32>
    %133 = arith.negf %132 : vector<8x8xf32>
    %134 = math.exp %133 : vector<8x8xf32>
    %cst_32 = arith.constant 1.000000e+00 : f32
    %135 = vector.broadcast %cst_32 : f32 to vector<8x8xf32>
    %136 = arith.addf %135, %134 : vector<8x8xf32>
    %137 = arith.divf %135, %136 : vector<8x8xf32>
    %138 = math.tanh %128 : vector<8x8xf32>
    %139 = arith.mulf %137, %138 : vector<8x8xf32>
    %cst_33 = arith.constant dense<0.000000e+00> : vector<8x8xf32>
    %140 = tpu.matmul %0, %139, %cst_33 {dimension_numbers = #tpu.dot_dimension_numbers<[1], [0], [0], [1], [0, 0, 1, 1], [], []>} : vector<8x8xf32>, vector<8x8xf32>, vector<8x8xf32> -> vector<8x8xf32>
    %141 = tpu.concatenate %139, %140 in 1 : vector<8x8xf32>, vector<8x8xf32> -> vector<8x16xf32>
    %cst_34 = arith.constant dense<0.000000e+00> : vector<8x32xf32>
    %142 = tpu.matmul %141, %1, %cst_34 {dimension_numbers = #tpu.dot_dimension_numbers<[1], [0], [0], [1], [0, 0, 1, 1], [], []>} : vector<8x16xf32>, vector<16x32xf32>, vector<8x32xf32> -> vector<8x32xf32>
    %143 = vector.extract_strided_slice %17 {offsets = [3, 0, 0], sizes = [1, 8, 32], strides = [1, 1, 1]} : vector<4x8x32xf32> to vector<1x8x32xf32>
    %144 = vector.shape_cast %143 : vector<1x8x32xf32> to vector<8x32xf32>
    %145 = arith.addf %142, %144 : vector<8x32xf32>
    %146 = vector.extract_strided_slice %145 {offsets = [0, 0], sizes = [8, 8], strides = [1, 1]} : vector<8x32xf32> to vector<8x8xf32>
    %147 = vector.broadcast %3 : vector<1x8xf32> to vector<8x8xf32>
    %148 = arith.mulf %147, %128 : vector<8x8xf32>
    %149 = arith.addf %146, %148 : vector<8x8xf32>
    %150 = arith.negf %149 : vector<8x8xf32>
    %151 = math.exp %150 : vector<8x8xf32>
    %cst_35 = arith.constant 1.000000e+00 : f32
    %152 = vector.broadcast %cst_35 : f32 to vector<8x8xf32>
    %153 = arith.addf %152, %151 : vector<8x8xf32>
    %154 = arith.divf %152, %153 : vector<8x8xf32>
    %155 = vector.extract_strided_slice %145 {offsets = [0, 8], sizes = [8, 8], strides = [1, 1]} : vector<8x32xf32> to vector<8x8xf32>
    %156 = vector.broadcast %5 : vector<1x8xf32> to vector<8x8xf32>
    %157 = arith.mulf %156, %128 : vector<8x8xf32>
    %158 = arith.addf %155, %157 : vector<8x8xf32>
    %159 = arith.negf %158 : vector<8x8xf32>
    %160 = math.exp %159 : vector<8x8xf32>
    %cst_36 = arith.constant 1.000000e+00 : f32
    %161 = vector.broadcast %cst_36 : f32 to vector<8x8xf32>
    %162 = arith.addf %161, %160 : vector<8x8xf32>
    %163 = arith.divf %161, %162 : vector<8x8xf32>
    %164 = vector.extract_strided_slice %145 {offsets = [0, 16], sizes = [8, 8], strides = [1, 1]} : vector<8x32xf32> to vector<8x8xf32>
    %165 = math.tanh %164 : vector<8x8xf32>
    %166 = arith.mulf %163, %128 : vector<8x8xf32>
    %167 = arith.mulf %154, %165 : vector<8x8xf32>
    %168 = arith.addf %166, %167 : vector<8x8xf32>
    %169 = vector.extract_strided_slice %145 {offsets = [0, 24], sizes = [8, 8], strides = [1, 1]} : vector<8x32xf32> to vector<8x8xf32>
    %170 = vector.broadcast %7 : vector<1x8xf32> to vector<8x8xf32>
    %171 = arith.mulf %170, %168 : vector<8x8xf32>
    %172 = arith.addf %169, %171 : vector<8x8xf32>
    %173 = arith.negf %172 : vector<8x8xf32>
    %174 = math.exp %173 : vector<8x8xf32>
    %cst_37 = arith.constant 1.000000e+00 : f32
    %175 = vector.broadcast %cst_37 : f32 to vector<8x8xf32>
    %176 = arith.addf %175, %174 : vector<8x8xf32>
    %177 = arith.divf %175, %176 : vector<8x8xf32>
    %178 = math.tanh %168 : vector<8x8xf32>
    %179 = arith.mulf %177, %178 : vector<8x8xf32>
    %c0_38 = arith.constant 0 : index
    %c0_39 = arith.constant 0 : index
    %180 = vector.load %arg9[%c0_38, %c0_39] : memref<12x32xf32, #tpu.memory_space<vmem>>, vector<12x32xf32>
    %c0_40 = arith.constant 0 : index
    %c0_41 = arith.constant 0 : index
    %181 = vector.load %arg10[%c0_40, %c0_41] : memref<1x32xf32, #tpu.memory_space<vmem>>, vector<1x32xf32>
    %c0_42 = arith.constant 0 : index
    %c0_43 = arith.constant 0 : index
    %182 = vector.load %arg11[%c0_42, %c0_43] : memref<8x16xf32, #tpu.memory_space<vmem>>, vector<8x16xf32>
    %c0_44 = arith.constant 0 : index
    %c0_45 = arith.constant 0 : index
    %183 = vector.load %arg13[%c0_44, %c0_45] : memref<1x16xf32, #tpu.memory_space<vmem>>, vector<1x16xf32>
    %c0_46 = arith.constant 0 : index
    %c0_47 = arith.constant 0 : index
    %184 = vector.load %arg15[%c0_46, %c0_47] : memref<16x8xf32, #tpu.memory_space<vmem>>, vector<16x8xf32>
    %c0_48 = arith.constant 0 : index
    %c0_49 = arith.constant 0 : index
    %185 = vector.load %arg16[%c0_48, %c0_49] : memref<1x8xf32, #tpu.memory_space<vmem>>, vector<1x8xf32>
    %c0_50 = arith.constant 0 : index
    %c0_51 = arith.constant 0 : index
    %186 = vector.load %arg17[%c0_50, %c0_51] : memref<8x4xf32, #tpu.memory_space<vmem>>, vector<8x4xf32>
    %c0_52 = arith.constant 0 : index
    %c0_53 = arith.constant 0 : index
    %187 = vector.load %arg18[%c0_52, %c0_53] : memref<1x4xf32, #tpu.memory_space<vmem>>, vector<1x4xf32>
    %c0_54 = arith.constant 0 : index
    %c0_55 = arith.constant 0 : index
    %188 = vector.load %arg19[%c0_54, %c0_55] : memref<4x1xf32, #tpu.memory_space<vmem>>, vector<4x1xf32>
    %c0_56 = arith.constant 0 : index
    %c0_57 = arith.constant 0 : index
    %189 = vector.load %arg20[%c0_56, %c0_57] : memref<1x1xf32, #tpu.memory_space<vmem>>, vector<1x1xf32>
    %c0_58 = arith.constant 0 : index
    %c0_59 = arith.constant 0 : index
    %190 = vector.load %arg7[%c0_58, %c0_59] : memref<8x1xf32, #tpu.memory_space<vmem>>, vector<8x1xf32>
    %c0_60 = arith.constant 0 : index
    %c0_61 = arith.constant 0 : index
    %191 = vector.load %arg12[%c0_60, %c0_61] : memref<8x16xf32, #tpu.memory_space<vmem>>, vector<8x16xf32>
    %cst_62 = arith.constant dense<0.000000e+00> : vector<8x16xf32>
    %192 = tpu.matmul %179, %191, %cst_62 {dimension_numbers = #tpu.dot_dimension_numbers<[1], [0], [0], [1], [0, 0, 1, 1], [], []>} : vector<8x8xf32>, vector<8x16xf32>, vector<8x16xf32> -> vector<8x16xf32>
    %c0_63 = arith.constant 0 : index
    %c0_64 = arith.constant 0 : index
    %193 = vector.load %arg14[%c0_63, %c0_64] : memref<1x16xf32, #tpu.memory_space<vmem>>, vector<1x16xf32>
    %194 = vector.broadcast %193 : vector<1x16xf32> to vector<8x16xf32>
    %195 = arith.addf %192, %194 : vector<8x16xf32>
    %196 = vector.extract_strided_slice %195 {offsets = [0, 0], sizes = [4, 16], strides = [1, 1]} : vector<8x16xf32> to vector<4x16xf32>
    %197 = tpu.concatenate %196, %196 in 0 : vector<4x16xf32>, vector<4x16xf32> -> vector<8x16xf32>
    %198 = vector.extract_strided_slice %195 {offsets = [4, 0], sizes = [4, 16], strides = [1, 1]} : vector<8x16xf32> to vector<4x16xf32>
    %199 = tpu.concatenate %198, %198 in 0 : vector<4x16xf32>, vector<4x16xf32> -> vector<8x16xf32>
    %c0_65 = arith.constant 0 : index
    %c0_66 = arith.constant 0 : index
    %200 = vector.load %arg6[%c0_65, %c0_66] : memref<8x8xf32, #tpu.memory_space<vmem>>, vector<8x8xf32>
    %201 = vector.extract_strided_slice %200 {offsets = [0, 0], sizes = [8, 4], strides = [1, 1]} : vector<8x8xf32> to vector<8x4xf32>
    %202 = vector.extract_strided_slice %200 {offsets = [0, 4], sizes = [8, 4], strides = [1, 1]} : vector<8x8xf32> to vector<8x4xf32>
    %cst_67 = arith.constant 0.000000e+00 : f32
    %203 = vector.broadcast %cst_67 : f32 to vector<8x8xf32>
    %cst_68 = arith.constant 0.000000e+00 : f32
    %204 = vector.broadcast %cst_68 : f32 to vector<8x8xf32>
    %205 = tpu.concatenate %201, %203 in 1 : vector<8x4xf32>, vector<8x8xf32> -> vector<8x12xf32>
    %cst_69 = arith.constant dense<0.000000e+00> : vector<8x32xf32>
    %206 = tpu.matmul %205, %180, %cst_69 {dimension_numbers = #tpu.dot_dimension_numbers<[1], [0], [0], [1], [0, 0, 1, 1], [], []>} : vector<8x12xf32>, vector<12x32xf32>, vector<8x32xf32> -> vector<8x32xf32>
    %207 = vector.broadcast %181 : vector<1x32xf32> to vector<8x32xf32>
    %208 = arith.addf %206, %207 : vector<8x32xf32>
    %209 = vector.extract_strided_slice %208 {offsets = [0, 0], sizes = [8, 8], strides = [1, 1]} : vector<8x32xf32> to vector<8x8xf32>
    %210 = arith.negf %209 : vector<8x8xf32>
    %211 = math.exp %210 : vector<8x8xf32>
    %cst_70 = arith.constant 1.000000e+00 : f32
    %212 = vector.broadcast %cst_70 : f32 to vector<8x8xf32>
    %213 = arith.addf %212, %211 : vector<8x8xf32>
    %214 = arith.divf %212, %213 : vector<8x8xf32>
    %215 = vector.extract_strided_slice %208 {offsets = [0, 8], sizes = [8, 8], strides = [1, 1]} : vector<8x32xf32> to vector<8x8xf32>
    %216 = arith.negf %215 : vector<8x8xf32>
    %217 = math.exp %216 : vector<8x8xf32>
    %cst_71 = arith.constant 1.000000e+00 : f32
    %218 = vector.broadcast %cst_71 : f32 to vector<8x8xf32>
    %219 = arith.addf %218, %217 : vector<8x8xf32>
    %220 = arith.divf %218, %219 : vector<8x8xf32>
    %221 = vector.extract_strided_slice %208 {offsets = [0, 16], sizes = [8, 8], strides = [1, 1]} : vector<8x32xf32> to vector<8x8xf32>
    %222 = math.tanh %221 : vector<8x8xf32>
    %223 = vector.extract_strided_slice %208 {offsets = [0, 24], sizes = [8, 8], strides = [1, 1]} : vector<8x32xf32> to vector<8x8xf32>
    %224 = arith.negf %223 : vector<8x8xf32>
    %225 = math.exp %224 : vector<8x8xf32>
    %cst_72 = arith.constant 1.000000e+00 : f32
    %226 = vector.broadcast %cst_72 : f32 to vector<8x8xf32>
    %227 = arith.addf %226, %225 : vector<8x8xf32>
    %228 = arith.divf %226, %227 : vector<8x8xf32>
    %229 = arith.mulf %220, %204 : vector<8x8xf32>
    %230 = arith.mulf %214, %222 : vector<8x8xf32>
    %231 = arith.addf %229, %230 : vector<8x8xf32>
    %232 = math.tanh %231 : vector<8x8xf32>
    %233 = arith.mulf %228, %232 : vector<8x8xf32>
    %c0_73 = arith.constant 0 : index
    %c0_74 = arith.constant 0 : index
    %234 = vector.load %arg8[%c0_73, %c0_74] : memref<2x3xf32, #tpu.memory_space<vmem>>, vector<1x1xf32>
    %cst_75 = arith.constant dense<0.000000e+00> : vector<8x16xf32>
    %235 = tpu.matmul %233, %182, %cst_75 {dimension_numbers = #tpu.dot_dimension_numbers<[1], [0], [0], [1], [0, 0, 1, 1], [], []>} : vector<8x8xf32>, vector<8x16xf32>, vector<8x16xf32> -> vector<8x16xf32>
    %236 = arith.addf %235, %197 : vector<8x16xf32>
    %237 = vector.broadcast %234 : vector<1x1xf32> to vector<1x16xf32>
    %238 = arith.mulf %237, %183 : vector<1x16xf32>
    %239 = vector.broadcast %238 : vector<1x16xf32> to vector<8x16xf32>
    %240 = arith.addf %236, %239 : vector<8x16xf32>
    %cst_76 = arith.constant 0.000000e+00 : f32
    %241 = vector.broadcast %cst_76 : f32 to vector<8x16xf32>
    %242 = arith.maximumf %240, %241 : vector<8x16xf32>
    %cst_77 = arith.constant dense<0.000000e+00> : vector<8x8xf32>
    %243 = tpu.matmul %242, %184, %cst_77 {dimension_numbers = #tpu.dot_dimension_numbers<[1], [0], [0], [1], [0, 0, 1, 1], [], []>} : vector<8x16xf32>, vector<16x8xf32>, vector<8x8xf32> -> vector<8x8xf32>
    %244 = vector.broadcast %185 : vector<1x8xf32> to vector<8x8xf32>
    %245 = arith.addf %243, %244 : vector<8x8xf32>
    %cst_78 = arith.constant 0.000000e+00 : f32
    %246 = vector.broadcast %cst_78 : f32 to vector<8x8xf32>
    %247 = arith.maximumf %245, %246 : vector<8x8xf32>
    %cst_79 = arith.constant dense<0.000000e+00> : vector<8x4xf32>
    %248 = tpu.matmul %247, %186, %cst_79 {dimension_numbers = #tpu.dot_dimension_numbers<[1], [0], [0], [1], [0, 0, 1, 1], [], []>} : vector<8x8xf32>, vector<8x4xf32>, vector<8x4xf32> -> vector<8x4xf32>
    %249 = vector.broadcast %187 : vector<1x4xf32> to vector<8x4xf32>
    %250 = arith.addf %248, %249 : vector<8x4xf32>
    %cst_80 = arith.constant 0.000000e+00 : f32
    %251 = vector.broadcast %cst_80 : f32 to vector<8x4xf32>
    %252 = arith.maximumf %250, %251 : vector<8x4xf32>
    %cst_81 = arith.constant dense<0.000000e+00> : vector<8x1xf32>
    %253 = tpu.matmul %252, %188, %cst_81 {dimension_numbers = #tpu.dot_dimension_numbers<[1], [0], [0], [1], [0, 0, 1, 1], [], []>} : vector<8x4xf32>, vector<4x1xf32>, vector<8x1xf32> -> vector<8x1xf32>
    %254 = vector.broadcast %189 : vector<1x1xf32> to vector<8x1xf32>
    %255 = arith.addf %253, %254 : vector<8x1xf32>
    %256 = arith.mulf %255, %190 : vector<8x1xf32>
    %257 = vector.extract_strided_slice %256 {offsets = [0, 0], sizes = [4, 1], strides = [1, 1]} : vector<8x1xf32> to vector<4x1xf32>
    %258 = vector.extract_strided_slice %256 {offsets = [4, 0], sizes = [4, 1], strides = [1, 1]} : vector<8x1xf32> to vector<4x1xf32>
    %259 = arith.addf %257, %258 : vector<4x1xf32>
    %c0_82 = arith.constant 0 : index
    %c0_83 = arith.constant 0 : index
    %260 = vector.load %arg21[%c0_82, %c0_83] : memref<4x6xf32, #tpu.memory_space<vmem>>, vector<4x1xf32>
    tpu.vector_store %arg21[%c0_82, %c0_83], %259 {strides = array<i32>} : memref<4x6xf32, #tpu.memory_space<vmem>>, vector<4x1xf32>,
    %261 = tpu.concatenate %202, %233 in 1 : vector<8x4xf32>, vector<8x8xf32> -> vector<8x12xf32>
    %cst_84 = arith.constant dense<0.000000e+00> : vector<8x32xf32>
    %262 = tpu.matmul %261, %180, %cst_84 {dimension_numbers = #tpu.dot_dimension_numbers<[1], [0], [0], [1], [0, 0, 1, 1], [], []>} : vector<8x12xf32>, vector<12x32xf32>, vector<8x32xf32> -> vector<8x32xf32>
    %263 = vector.broadcast %181 : vector<1x32xf32> to vector<8x32xf32>
    %264 = arith.addf %262, %263 : vector<8x32xf32>
    %265 = vector.extract_strided_slice %264 {offsets = [0, 0], sizes = [8, 8], strides = [1, 1]} : vector<8x32xf32> to vector<8x8xf32>
    %266 = arith.negf %265 : vector<8x8xf32>
    %267 = math.exp %266 : vector<8x8xf32>
    %cst_85 = arith.constant 1.000000e+00 : f32
    %268 = vector.broadcast %cst_85 : f32 to vector<8x8xf32>
    %269 = arith.addf %268, %267 : vector<8x8xf32>
    %270 = arith.divf %268, %269 : vector<8x8xf32>
    %271 = vector.extract_strided_slice %264 {offsets = [0, 8], sizes = [8, 8], strides = [1, 1]} : vector<8x32xf32> to vector<8x8xf32>
    %272 = arith.negf %271 : vector<8x8xf32>
    %273 = math.exp %272 : vector<8x8xf32>
    %cst_86 = arith.constant 1.000000e+00 : f32
    %274 = vector.broadcast %cst_86 : f32 to vector<8x8xf32>
    %275 = arith.addf %274, %273 : vector<8x8xf32>
    %276 = arith.divf %274, %275 : vector<8x8xf32>
    %277 = vector.extract_strided_slice %264 {offsets = [0, 16], sizes = [8, 8], strides = [1, 1]} : vector<8x32xf32> to vector<8x8xf32>
    %278 = math.tanh %277 : vector<8x8xf32>
    %279 = vector.extract_strided_slice %264 {offsets = [0, 24], sizes = [8, 8], strides = [1, 1]} : vector<8x32xf32> to vector<8x8xf32>
    %280 = arith.negf %279 : vector<8x8xf32>
    %281 = math.exp %280 : vector<8x8xf32>
    %cst_87 = arith.constant 1.000000e+00 : f32
    %282 = vector.broadcast %cst_87 : f32 to vector<8x8xf32>
    %283 = arith.addf %282, %281 : vector<8x8xf32>
    %284 = arith.divf %282, %283 : vector<8x8xf32>
    %285 = arith.mulf %276, %231 : vector<8x8xf32>
    %286 = arith.mulf %270, %278 : vector<8x8xf32>
    %287 = arith.addf %285, %286 : vector<8x8xf32>
    %288 = math.tanh %287 : vector<8x8xf32>
    %289 = arith.mulf %284, %288 : vector<8x8xf32>
    %c1_88 = arith.constant 1 : index
    %c0_89 = arith.constant 0 : index
    %290 = vector.load %arg8[%c1_88, %c0_89] : memref<2x3xf32, #tpu.memory_space<vmem>>, vector<1x1xf32>
    %cst_90 = arith.constant dense<0.000000e+00> : vector<8x16xf32>
    %291 = tpu.matmul %289, %182, %cst_90 {dimension_numbers = #tpu.dot_dimension_numbers<[1], [0], [0], [1], [0, 0, 1, 1], [], []>} : vector<8x8xf32>, vector<8x16xf32>, vector<8x16xf32> -> vector<8x16xf32>
    %292 = arith.addf %291, %199 : vector<8x16xf32>
    %293 = vector.broadcast %290 : vector<1x1xf32> to vector<1x16xf32>
    %294 = arith.mulf %293, %183 : vector<1x16xf32>
    %295 = vector.broadcast %294 : vector<1x16xf32> to vector<8x16xf32>
    %296 = arith.addf %292, %295 : vector<8x16xf32>
    %cst_91 = arith.constant 0.000000e+00 : f32
    %297 = vector.broadcast %cst_91 : f32 to vector<8x16xf32>
    %298 = arith.maximumf %296, %297 : vector<8x16xf32>
    %cst_92 = arith.constant dense<0.000000e+00> : vector<8x8xf32>
    %299 = tpu.matmul %298, %184, %cst_92 {dimension_numbers = #tpu.dot_dimension_numbers<[1], [0], [0], [1], [0, 0, 1, 1], [], []>} : vector<8x16xf32>, vector<16x8xf32>, vector<8x8xf32> -> vector<8x8xf32>
    %300 = vector.broadcast %185 : vector<1x8xf32> to vector<8x8xf32>
    %301 = arith.addf %299, %300 : vector<8x8xf32>
    %cst_93 = arith.constant 0.000000e+00 : f32
    %302 = vector.broadcast %cst_93 : f32 to vector<8x8xf32>
    %303 = arith.maximumf %301, %302 : vector<8x8xf32>
    %cst_94 = arith.constant dense<0.000000e+00> : vector<8x4xf32>
    %304 = tpu.matmul %303, %186, %cst_94 {dimension_numbers = #tpu.dot_dimension_numbers<[1], [0], [0], [1], [0, 0, 1, 1], [], []>} : vector<8x8xf32>, vector<8x4xf32>, vector<8x4xf32> -> vector<8x4xf32>
    %305 = vector.broadcast %187 : vector<1x4xf32> to vector<8x4xf32>
    %306 = arith.addf %304, %305 : vector<8x4xf32>
    %cst_95 = arith.constant 0.000000e+00 : f32
    %307 = vector.broadcast %cst_95 : f32 to vector<8x4xf32>
    %308 = arith.maximumf %306, %307 : vector<8x4xf32>
    %cst_96 = arith.constant dense<0.000000e+00> : vector<8x1xf32>
    %309 = tpu.matmul %308, %188, %cst_96 {dimension_numbers = #tpu.dot_dimension_numbers<[1], [0], [0], [1], [0, 0, 1, 1], [], []>} : vector<8x4xf32>, vector<4x1xf32>, vector<8x1xf32> -> vector<8x1xf32>
    %310 = vector.broadcast %189 : vector<1x1xf32> to vector<8x1xf32>
    %311 = arith.addf %309, %310 : vector<8x1xf32>
    %312 = arith.mulf %311, %190 : vector<8x1xf32>
    %313 = vector.extract_strided_slice %312 {offsets = [0, 0], sizes = [4, 1], strides = [1, 1]} : vector<8x1xf32> to vector<4x1xf32>
    %314 = vector.extract_strided_slice %312 {offsets = [4, 0], sizes = [4, 1], strides = [1, 1]} : vector<8x1xf32> to vector<4x1xf32>
    %315 = arith.addf %313, %314 : vector<4x1xf32>
    %c0_97 = arith.constant 0 : index
    %c3 = arith.constant 3 : index
    %316 = vector.load %arg21[%c0_97, %c3] : memref<4x6xf32, #tpu.memory_space<vmem>>, vector<4x1xf32>
    tpu.vector_store %arg21[%c0_97, %c3], %315 {strides = array<i32>} : memref<4x6xf32, #tpu.memory_space<vmem>>, vector<4x1xf32>,
    %cst_98 = arith.constant 0.000000e+00 : f32
    %317 = vector.broadcast %cst_98 : f32 to vector<8x8xf32>
    %cst_99 = arith.constant 0.000000e+00 : f32
    %318 = vector.broadcast %cst_99 : f32 to vector<8x8xf32>
    %319 = tpu.concatenate %250, %317 in 1 : vector<8x4xf32>, vector<8x8xf32> -> vector<8x12xf32>
    %cst_100 = arith.constant dense<0.000000e+00> : vector<8x32xf32>
    %320 = tpu.matmul %319, %180, %cst_100 {dimension_numbers = #tpu.dot_dimension_numbers<[1], [0], [0], [1], [0, 0, 1, 1], [], []>} : vector<8x12xf32>, vector<12x32xf32>, vector<8x32xf32> -> vector<8x32xf32>
    %321 = vector.broadcast %181 : vector<1x32xf32> to vector<8x32xf32>
    %322 = arith.addf %320, %321 : vector<8x32xf32>
    %323 = vector.extract_strided_slice %322 {offsets = [0, 0], sizes = [8, 8], strides = [1, 1]} : vector<8x32xf32> to vector<8x8xf32>
    %324 = arith.negf %323 : vector<8x8xf32>
    %325 = math.exp %324 : vector<8x8xf32>
    %cst_101 = arith.constant 1.000000e+00 : f32
    %326 = vector.broadcast %cst_101 : f32 to vector<8x8xf32>
    %327 = arith.addf %326, %325 : vector<8x8xf32>
    %328 = arith.divf %326, %327 : vector<8x8xf32>
    %329 = vector.extract_strided_slice %322 {offsets = [0, 8], sizes = [8, 8], strides = [1, 1]} : vector<8x32xf32> to vector<8x8xf32>
    %330 = arith.negf %329 : vector<8x8xf32>
    %331 = math.exp %330 : vector<8x8xf32>
    %cst_102 = arith.constant 1.000000e+00 : f32
    %332 = vector.broadcast %cst_102 : f32 to vector<8x8xf32>
    %333 = arith.addf %332, %331 : vector<8x8xf32>
    %334 = arith.divf %332, %333 : vector<8x8xf32>
    %335 = vector.extract_strided_slice %322 {offsets = [0, 16], sizes = [8, 8], strides = [1, 1]} : vector<8x32xf32> to vector<8x8xf32>
    %336 = math.tanh %335 : vector<8x8xf32>
    %337 = vector.extract_strided_slice %322 {offsets = [0, 24], sizes = [8, 8], strides = [1, 1]} : vector<8x32xf32> to vector<8x8xf32>
    %338 = arith.negf %337 : vector<8x8xf32>
    %339 = math.exp %338 : vector<8x8xf32>
    %cst_103 = arith.constant 1.000000e+00 : f32
    %340 = vector.broadcast %cst_103 : f32 to vector<8x8xf32>
    %341 = arith.addf %340, %339 : vector<8x8xf32>
    %342 = arith.divf %340, %341 : vector<8x8xf32>
    %343 = arith.mulf %334, %318 : vector<8x8xf32>
    %344 = arith.mulf %328, %336 : vector<8x8xf32>
    %345 = arith.addf %343, %344 : vector<8x8xf32>
    %346 = math.tanh %345 : vector<8x8xf32>
    %347 = arith.mulf %342, %346 : vector<8x8xf32>
    %c0_104 = arith.constant 0 : index
    %c1_105 = arith.constant 1 : index
    %348 = vector.load %arg8[%c0_104, %c1_105] : memref<2x3xf32, #tpu.memory_space<vmem>>, vector<1x1xf32>
    %cst_106 = arith.constant dense<0.000000e+00> : vector<8x16xf32>
    %349 = tpu.matmul %347, %182, %cst_106 {dimension_numbers = #tpu.dot_dimension_numbers<[1], [0], [0], [1], [0, 0, 1, 1], [], []>} : vector<8x8xf32>, vector<8x16xf32>, vector<8x16xf32> -> vector<8x16xf32>
    %350 = arith.addf %349, %197 : vector<8x16xf32>
    %351 = vector.broadcast %348 : vector<1x1xf32> to vector<1x16xf32>
    %352 = arith.mulf %351, %183 : vector<1x16xf32>
    %353 = vector.broadcast %352 : vector<1x16xf32> to vector<8x16xf32>
    %354 = arith.addf %350, %353 : vector<8x16xf32>
    %cst_107 = arith.constant 0.000000e+00 : f32
    %355 = vector.broadcast %cst_107 : f32 to vector<8x16xf32>
    %356 = arith.maximumf %354, %355 : vector<8x16xf32>
    %cst_108 = arith.constant dense<0.000000e+00> : vector<8x8xf32>
    %357 = tpu.matmul %356, %184, %cst_108 {dimension_numbers = #tpu.dot_dimension_numbers<[1], [0], [0], [1], [0, 0, 1, 1], [], []>} : vector<8x16xf32>, vector<16x8xf32>, vector<8x8xf32> -> vector<8x8xf32>
    %358 = vector.broadcast %185 : vector<1x8xf32> to vector<8x8xf32>
    %359 = arith.addf %357, %358 : vector<8x8xf32>
    %cst_109 = arith.constant 0.000000e+00 : f32
    %360 = vector.broadcast %cst_109 : f32 to vector<8x8xf32>
    %361 = arith.maximumf %359, %360 : vector<8x8xf32>
    %cst_110 = arith.constant dense<0.000000e+00> : vector<8x4xf32>
    %362 = tpu.matmul %361, %186, %cst_110 {dimension_numbers = #tpu.dot_dimension_numbers<[1], [0], [0], [1], [0, 0, 1, 1], [], []>} : vector<8x8xf32>, vector<8x4xf32>, vector<8x4xf32> -> vector<8x4xf32>
    %363 = vector.broadcast %187 : vector<1x4xf32> to vector<8x4xf32>
    %364 = arith.addf %362, %363 : vector<8x4xf32>
    %cst_111 = arith.constant 0.000000e+00 : f32
    %365 = vector.broadcast %cst_111 : f32 to vector<8x4xf32>
    %366 = arith.maximumf %364, %365 : vector<8x4xf32>
    %cst_112 = arith.constant dense<0.000000e+00> : vector<8x1xf32>
    %367 = tpu.matmul %366, %188, %cst_112 {dimension_numbers = #tpu.dot_dimension_numbers<[1], [0], [0], [1], [0, 0, 1, 1], [], []>} : vector<8x4xf32>, vector<4x1xf32>, vector<8x1xf32> -> vector<8x1xf32>
    %368 = vector.broadcast %189 : vector<1x1xf32> to vector<8x1xf32>
    %369 = arith.addf %367, %368 : vector<8x1xf32>
    %370 = arith.mulf %369, %190 : vector<8x1xf32>
    %371 = vector.extract_strided_slice %370 {offsets = [0, 0], sizes = [4, 1], strides = [1, 1]} : vector<8x1xf32> to vector<4x1xf32>
    %372 = vector.extract_strided_slice %370 {offsets = [4, 0], sizes = [4, 1], strides = [1, 1]} : vector<8x1xf32> to vector<4x1xf32>
    %373 = arith.addf %371, %372 : vector<4x1xf32>
    %c0_113 = arith.constant 0 : index
    %c1_114 = arith.constant 1 : index
    %374 = vector.load %arg21[%c0_113, %c1_114] : memref<4x6xf32, #tpu.memory_space<vmem>>, vector<4x1xf32>
    tpu.vector_store %arg21[%c0_113, %c1_114], %373 {strides = array<i32>} : memref<4x6xf32, #tpu.memory_space<vmem>>, vector<4x1xf32>,
    %375 = tpu.concatenate %306, %347 in 1 : vector<8x4xf32>, vector<8x8xf32> -> vector<8x12xf32>
    %cst_115 = arith.constant dense<0.000000e+00> : vector<8x32xf32>
    %376 = tpu.matmul %375, %180, %cst_115 {dimension_numbers = #tpu.dot_dimension_numbers<[1], [0], [0], [1], [0, 0, 1, 1], [], []>} : vector<8x12xf32>, vector<12x32xf32>, vector<8x32xf32> -> vector<8x32xf32>
    %377 = vector.broadcast %181 : vector<1x32xf32> to vector<8x32xf32>
    %378 = arith.addf %376, %377 : vector<8x32xf32>
    %379 = vector.extract_strided_slice %378 {offsets = [0, 0], sizes = [8, 8], strides = [1, 1]} : vector<8x32xf32> to vector<8x8xf32>
    %380 = arith.negf %379 : vector<8x8xf32>
    %381 = math.exp %380 : vector<8x8xf32>
    %cst_116 = arith.constant 1.000000e+00 : f32
    %382 = vector.broadcast %cst_116 : f32 to vector<8x8xf32>
    %383 = arith.addf %382, %381 : vector<8x8xf32>
    %384 = arith.divf %382, %383 : vector<8x8xf32>
    %385 = vector.extract_strided_slice %378 {offsets = [0, 8], sizes = [8, 8], strides = [1, 1]} : vector<8x32xf32> to vector<8x8xf32>
    %386 = arith.negf %385 : vector<8x8xf32>
    %387 = math.exp %386 : vector<8x8xf32>
    %cst_117 = arith.constant 1.000000e+00 : f32
    %388 = vector.broadcast %cst_117 : f32 to vector<8x8xf32>
    %389 = arith.addf %388, %387 : vector<8x8xf32>
    %390 = arith.divf %388, %389 : vector<8x8xf32>
    %391 = vector.extract_strided_slice %378 {offsets = [0, 16], sizes = [8, 8], strides = [1, 1]} : vector<8x32xf32> to vector<8x8xf32>
    %392 = math.tanh %391 : vector<8x8xf32>
    %393 = vector.extract_strided_slice %378 {offsets = [0, 24], sizes = [8, 8], strides = [1, 1]} : vector<8x32xf32> to vector<8x8xf32>
    %394 = arith.negf %393 : vector<8x8xf32>
    %395 = math.exp %394 : vector<8x8xf32>
    %cst_118 = arith.constant 1.000000e+00 : f32
    %396 = vector.broadcast %cst_118 : f32 to vector<8x8xf32>
    %397 = arith.addf %396, %395 : vector<8x8xf32>
    %398 = arith.divf %396, %397 : vector<8x8xf32>
    %399 = arith.mulf %390, %345 : vector<8x8xf32>
    %400 = arith.mulf %384, %392 : vector<8x8xf32>
    %401 = arith.addf %399, %400 : vector<8x8xf32>
    %402 = math.tanh %401 : vector<8x8xf32>
    %403 = arith.mulf %398, %402 : vector<8x8xf32>
    %c1_119 = arith.constant 1 : index
    %c1_120 = arith.constant 1 : index
    %404 = vector.load %arg8[%c1_119, %c1_120] : memref<2x3xf32, #tpu.memory_space<vmem>>, vector<1x1xf32>
    %cst_121 = arith.constant dense<0.000000e+00> : vector<8x16xf32>
    %405 = tpu.matmul %403, %182, %cst_121 {dimension_numbers = #tpu.dot_dimension_numbers<[1], [0], [0], [1], [0, 0, 1, 1], [], []>} : vector<8x8xf32>, vector<8x16xf32>, vector<8x16xf32> -> vector<8x16xf32>
    %406 = arith.addf %405, %199 : vector<8x16xf32>
    %407 = vector.broadcast %404 : vector<1x1xf32> to vector<1x16xf32>
    %408 = arith.mulf %407, %183 : vector<1x16xf32>
    %409 = vector.broadcast %408 : vector<1x16xf32> to vector<8x16xf32>
    %410 = arith.addf %406, %409 : vector<8x16xf32>
    %cst_122 = arith.constant 0.000000e+00 : f32
    %411 = vector.broadcast %cst_122 : f32 to vector<8x16xf32>
    %412 = arith.maximumf %410, %411 : vector<8x16xf32>
    %cst_123 = arith.constant dense<0.000000e+00> : vector<8x8xf32>
    %413 = tpu.matmul %412, %184, %cst_123 {dimension_numbers = #tpu.dot_dimension_numbers<[1], [0], [0], [1], [0, 0, 1, 1], [], []>} : vector<8x16xf32>, vector<16x8xf32>, vector<8x8xf32> -> vector<8x8xf32>
    %414 = vector.broadcast %185 : vector<1x8xf32> to vector<8x8xf32>
    %415 = arith.addf %413, %414 : vector<8x8xf32>
    %cst_124 = arith.constant 0.000000e+00 : f32
    %416 = vector.broadcast %cst_124 : f32 to vector<8x8xf32>
    %417 = arith.maximumf %415, %416 : vector<8x8xf32>
    %cst_125 = arith.constant dense<0.000000e+00> : vector<8x4xf32>
    %418 = tpu.matmul %417, %186, %cst_125 {dimension_numbers = #tpu.dot_dimension_numbers<[1], [0], [0], [1], [0, 0, 1, 1], [], []>} : vector<8x8xf32>, vector<8x4xf32>, vector<8x4xf32> -> vector<8x4xf32>
    %419 = vector.broadcast %187 : vector<1x4xf32> to vector<8x4xf32>
    %420 = arith.addf %418, %419 : vector<8x4xf32>
    %cst_126 = arith.constant 0.000000e+00 : f32
    %421 = vector.broadcast %cst_126 : f32 to vector<8x4xf32>
    %422 = arith.maximumf %420, %421 : vector<8x4xf32>
    %cst_127 = arith.constant dense<0.000000e+00> : vector<8x1xf32>
    %423 = tpu.matmul %422, %188, %cst_127 {dimension_numbers = #tpu.dot_dimension_numbers<[1], [0], [0], [1], [0, 0, 1, 1], [], []>} : vector<8x4xf32>, vector<4x1xf32>, vector<8x1xf32> -> vector<8x1xf32>
    %424 = vector.broadcast %189 : vector<1x1xf32> to vector<8x1xf32>
    %425 = arith.addf %423, %424 : vector<8x1xf32>
    %426 = arith.mulf %425, %190 : vector<8x1xf32>
    %427 = vector.extract_strided_slice %426 {offsets = [0, 0], sizes = [4, 1], strides = [1, 1]} : vector<8x1xf32> to vector<4x1xf32>
    %428 = vector.extract_strided_slice %426 {offsets = [4, 0], sizes = [4, 1], strides = [1, 1]} : vector<8x1xf32> to vector<4x1xf32>
    %429 = arith.addf %427, %428 : vector<4x1xf32>
    %c0_128 = arith.constant 0 : index
    %c4 = arith.constant 4 : index
    %430 = vector.load %arg21[%c0_128, %c4] : memref<4x6xf32, #tpu.memory_space<vmem>>, vector<4x1xf32>
    tpu.vector_store %arg21[%c0_128, %c4], %429 {strides = array<i32>} : memref<4x6xf32, #tpu.memory_space<vmem>>, vector<4x1xf32>,
    %cst_129 = arith.constant 0.000000e+00 : f32
    %431 = vector.broadcast %cst_129 : f32 to vector<8x8xf32>
    %cst_130 = arith.constant 0.000000e+00 : f32
    %432 = vector.broadcast %cst_130 : f32 to vector<8x8xf32>
    %433 = tpu.concatenate %364, %431 in 1 : vector<8x4xf32>, vector<8x8xf32> -> vector<8x12xf32>
    %cst_131 = arith.constant dense<0.000000e+00> : vector<8x32xf32>
    %434 = tpu.matmul %433, %180, %cst_131 {dimension_numbers = #tpu.dot_dimension_numbers<[1], [0], [0], [1], [0, 0, 1, 1], [], []>} : vector<8x12xf32>, vector<12x32xf32>, vector<8x32xf32> -> vector<8x32xf32>
    %435 = vector.broadcast %181 : vector<1x32xf32> to vector<8x32xf32>
    %436 = arith.addf %434, %435 : vector<8x32xf32>
    %437 = vector.extract_strided_slice %436 {offsets = [0, 0], sizes = [8, 8], strides = [1, 1]} : vector<8x32xf32> to vector<8x8xf32>
    %438 = arith.negf %437 : vector<8x8xf32>
    %439 = math.exp %438 : vector<8x8xf32>
    %cst_132 = arith.constant 1.000000e+00 : f32
    %440 = vector.broadcast %cst_132 : f32 to vector<8x8xf32>
    %441 = arith.addf %440, %439 : vector<8x8xf32>
    %442 = arith.divf %440, %441 : vector<8x8xf32>
    %443 = vector.extract_strided_slice %436 {offsets = [0, 8], sizes = [8, 8], strides = [1, 1]} : vector<8x32xf32> to vector<8x8xf32>
    %444 = arith.negf %443 : vector<8x8xf32>
    %445 = math.exp %444 : vector<8x8xf32>
    %cst_133 = arith.constant 1.000000e+00 : f32
    %446 = vector.broadcast %cst_133 : f32 to vector<8x8xf32>
    %447 = arith.addf %446, %445 : vector<8x8xf32>
    %448 = arith.divf %446, %447 : vector<8x8xf32>
    %449 = vector.extract_strided_slice %436 {offsets = [0, 16], sizes = [8, 8], strides = [1, 1]} : vector<8x32xf32> to vector<8x8xf32>
    %450 = math.tanh %449 : vector<8x8xf32>
    %451 = vector.extract_strided_slice %436 {offsets = [0, 24], sizes = [8, 8], strides = [1, 1]} : vector<8x32xf32> to vector<8x8xf32>
    %452 = arith.negf %451 : vector<8x8xf32>
    %453 = math.exp %452 : vector<8x8xf32>
    %cst_134 = arith.constant 1.000000e+00 : f32
    %454 = vector.broadcast %cst_134 : f32 to vector<8x8xf32>
    %455 = arith.addf %454, %453 : vector<8x8xf32>
    %456 = arith.divf %454, %455 : vector<8x8xf32>
    %457 = arith.mulf %448, %432 : vector<8x8xf32>
    %458 = arith.mulf %442, %450 : vector<8x8xf32>
    %459 = arith.addf %457, %458 : vector<8x8xf32>
    %460 = math.tanh %459 : vector<8x8xf32>
    %461 = arith.mulf %456, %460 : vector<8x8xf32>
    %c0_135 = arith.constant 0 : index
    %c2_136 = arith.constant 2 : index
    %462 = vector.load %arg8[%c0_135, %c2_136] : memref<2x3xf32, #tpu.memory_space<vmem>>, vector<1x1xf32>
    %cst_137 = arith.constant dense<0.000000e+00> : vector<8x16xf32>
    %463 = tpu.matmul %461, %182, %cst_137 {dimension_numbers = #tpu.dot_dimension_numbers<[1], [0], [0], [1], [0, 0, 1, 1], [], []>} : vector<8x8xf32>, vector<8x16xf32>, vector<8x16xf32> -> vector<8x16xf32>
    %464 = arith.addf %463, %197 : vector<8x16xf32>
    %465 = vector.broadcast %462 : vector<1x1xf32> to vector<1x16xf32>
    %466 = arith.mulf %465, %183 : vector<1x16xf32>
    %467 = vector.broadcast %466 : vector<1x16xf32> to vector<8x16xf32>
    %468 = arith.addf %464, %467 : vector<8x16xf32>
    %cst_138 = arith.constant 0.000000e+00 : f32
    %469 = vector.broadcast %cst_138 : f32 to vector<8x16xf32>
    %470 = arith.maximumf %468, %469 : vector<8x16xf32>
    %cst_139 = arith.constant dense<0.000000e+00> : vector<8x8xf32>
    %471 = tpu.matmul %470, %184, %cst_139 {dimension_numbers = #tpu.dot_dimension_numbers<[1], [0], [0], [1], [0, 0, 1, 1], [], []>} : vector<8x16xf32>, vector<16x8xf32>, vector<8x8xf32> -> vector<8x8xf32>
    %472 = vector.broadcast %185 : vector<1x8xf32> to vector<8x8xf32>
    %473 = arith.addf %471, %472 : vector<8x8xf32>
    %cst_140 = arith.constant 0.000000e+00 : f32
    %474 = vector.broadcast %cst_140 : f32 to vector<8x8xf32>
    %475 = arith.maximumf %473, %474 : vector<8x8xf32>
    %cst_141 = arith.constant dense<0.000000e+00> : vector<8x4xf32>
    %476 = tpu.matmul %475, %186, %cst_141 {dimension_numbers = #tpu.dot_dimension_numbers<[1], [0], [0], [1], [0, 0, 1, 1], [], []>} : vector<8x8xf32>, vector<8x4xf32>, vector<8x4xf32> -> vector<8x4xf32>
    %477 = vector.broadcast %187 : vector<1x4xf32> to vector<8x4xf32>
    %478 = arith.addf %476, %477 : vector<8x4xf32>
    %cst_142 = arith.constant 0.000000e+00 : f32
    %479 = vector.broadcast %cst_142 : f32 to vector<8x4xf32>
    %480 = arith.maximumf %478, %479 : vector<8x4xf32>
    %cst_143 = arith.constant dense<0.000000e+00> : vector<8x1xf32>
    %481 = tpu.matmul %480, %188, %cst_143 {dimension_numbers = #tpu.dot_dimension_numbers<[1], [0], [0], [1], [0, 0, 1, 1], [], []>} : vector<8x4xf32>, vector<4x1xf32>, vector<8x1xf32> -> vector<8x1xf32>
    %482 = vector.broadcast %189 : vector<1x1xf32> to vector<8x1xf32>
    %483 = arith.addf %481, %482 : vector<8x1xf32>
    %484 = arith.mulf %483, %190 : vector<8x1xf32>
    %485 = vector.extract_strided_slice %484 {offsets = [0, 0], sizes = [4, 1], strides = [1, 1]} : vector<8x1xf32> to vector<4x1xf32>
    %486 = vector.extract_strided_slice %484 {offsets = [4, 0], sizes = [4, 1], strides = [1, 1]} : vector<8x1xf32> to vector<4x1xf32>
    %487 = arith.addf %485, %486 : vector<4x1xf32>
    %c0_144 = arith.constant 0 : index
    %c2_145 = arith.constant 2 : index
    %488 = vector.load %arg21[%c0_144, %c2_145] : memref<4x6xf32, #tpu.memory_space<vmem>>, vector<4x1xf32>
    tpu.vector_store %arg21[%c0_144, %c2_145], %487 {strides = array<i32>} : memref<4x6xf32, #tpu.memory_space<vmem>>, vector<4x1xf32>,
    %489 = tpu.concatenate %420, %461 in 1 : vector<8x4xf32>, vector<8x8xf32> -> vector<8x12xf32>
    %cst_146 = arith.constant dense<0.000000e+00> : vector<8x32xf32>
    %490 = tpu.matmul %489, %180, %cst_146 {dimension_numbers = #tpu.dot_dimension_numbers<[1], [0], [0], [1], [0, 0, 1, 1], [], []>} : vector<8x12xf32>, vector<12x32xf32>, vector<8x32xf32> -> vector<8x32xf32>
    %491 = vector.broadcast %181 : vector<1x32xf32> to vector<8x32xf32>
    %492 = arith.addf %490, %491 : vector<8x32xf32>
    %493 = vector.extract_strided_slice %492 {offsets = [0, 0], sizes = [8, 8], strides = [1, 1]} : vector<8x32xf32> to vector<8x8xf32>
    %494 = arith.negf %493 : vector<8x8xf32>
    %495 = math.exp %494 : vector<8x8xf32>
    %cst_147 = arith.constant 1.000000e+00 : f32
    %496 = vector.broadcast %cst_147 : f32 to vector<8x8xf32>
    %497 = arith.addf %496, %495 : vector<8x8xf32>
    %498 = arith.divf %496, %497 : vector<8x8xf32>
    %499 = vector.extract_strided_slice %492 {offsets = [0, 8], sizes = [8, 8], strides = [1, 1]} : vector<8x32xf32> to vector<8x8xf32>
    %500 = arith.negf %499 : vector<8x8xf32>
    %501 = math.exp %500 : vector<8x8xf32>
    %cst_148 = arith.constant 1.000000e+00 : f32
    %502 = vector.broadcast %cst_148 : f32 to vector<8x8xf32>
    %503 = arith.addf %502, %501 : vector<8x8xf32>
    %504 = arith.divf %502, %503 : vector<8x8xf32>
    %505 = vector.extract_strided_slice %492 {offsets = [0, 16], sizes = [8, 8], strides = [1, 1]} : vector<8x32xf32> to vector<8x8xf32>
    %506 = math.tanh %505 : vector<8x8xf32>
    %507 = vector.extract_strided_slice %492 {offsets = [0, 24], sizes = [8, 8], strides = [1, 1]} : vector<8x32xf32> to vector<8x8xf32>
    %508 = arith.negf %507 : vector<8x8xf32>
    %509 = math.exp %508 : vector<8x8xf32>
    %cst_149 = arith.constant 1.000000e+00 : f32
    %510 = vector.broadcast %cst_149 : f32 to vector<8x8xf32>
    %511 = arith.addf %510, %509 : vector<8x8xf32>
    %512 = arith.divf %510, %511 : vector<8x8xf32>
    %513 = arith.mulf %504, %459 : vector<8x8xf32>
    %514 = arith.mulf %498, %506 : vector<8x8xf32>
    %515 = arith.addf %513, %514 : vector<8x8xf32>
    %516 = math.tanh %515 : vector<8x8xf32>
    %517 = arith.mulf %512, %516 : vector<8x8xf32>
    %c1_150 = arith.constant 1 : index
    %c2_151 = arith.constant 2 : index
    %518 = vector.load %arg8[%c1_150, %c2_151] : memref<2x3xf32, #tpu.memory_space<vmem>>, vector<1x1xf32>
    %cst_152 = arith.constant dense<0.000000e+00> : vector<8x16xf32>
    %519 = tpu.matmul %517, %182, %cst_152 {dimension_numbers = #tpu.dot_dimension_numbers<[1], [0], [0], [1], [0, 0, 1, 1], [], []>} : vector<8x8xf32>, vector<8x16xf32>, vector<8x16xf32> -> vector<8x16xf32>
    %520 = arith.addf %519, %199 : vector<8x16xf32>
    %521 = vector.broadcast %518 : vector<1x1xf32> to vector<1x16xf32>
    %522 = arith.mulf %521, %183 : vector<1x16xf32>
    %523 = vector.broadcast %522 : vector<1x16xf32> to vector<8x16xf32>
    %524 = arith.addf %520, %523 : vector<8x16xf32>
    %cst_153 = arith.constant 0.000000e+00 : f32
    %525 = vector.broadcast %cst_153 : f32 to vector<8x16xf32>
    %526 = arith.maximumf %524, %525 : vector<8x16xf32>
    %cst_154 = arith.constant dense<0.000000e+00> : vector<8x8xf32>
    %527 = tpu.matmul %526, %184, %cst_154 {dimension_numbers = #tpu.dot_dimension_numbers<[1], [0], [0], [1], [0, 0, 1, 1], [], []>} : vector<8x16xf32>, vector<16x8xf32>, vector<8x8xf32> -> vector<8x8xf32>
    %528 = vector.broadcast %185 : vector<1x8xf32> to vector<8x8xf32>
    %529 = arith.addf %527, %528 : vector<8x8xf32>
    %cst_155 = arith.constant 0.000000e+00 : f32
    %530 = vector.broadcast %cst_155 : f32 to vector<8x8xf32>
    %531 = arith.maximumf %529, %530 : vector<8x8xf32>
    %cst_156 = arith.constant dense<0.000000e+00> : vector<8x4xf32>
    %532 = tpu.matmul %531, %186, %cst_156 {dimension_numbers = #tpu.dot_dimension_numbers<[1], [0], [0], [1], [0, 0, 1, 1], [], []>} : vector<8x8xf32>, vector<8x4xf32>, vector<8x4xf32> -> vector<8x4xf32>
    %533 = vector.broadcast %187 : vector<1x4xf32> to vector<8x4xf32>
    %534 = arith.addf %532, %533 : vector<8x4xf32>
    %cst_157 = arith.constant 0.000000e+00 : f32
    %535 = vector.broadcast %cst_157 : f32 to vector<8x4xf32>
    %536 = arith.maximumf %534, %535 : vector<8x4xf32>
    %cst_158 = arith.constant dense<0.000000e+00> : vector<8x1xf32>
    %537 = tpu.matmul %536, %188, %cst_158 {dimension_numbers = #tpu.dot_dimension_numbers<[1], [0], [0], [1], [0, 0, 1, 1], [], []>} : vector<8x4xf32>, vector<4x1xf32>, vector<8x1xf32> -> vector<8x1xf32>
    %538 = vector.broadcast %189 : vector<1x1xf32> to vector<8x1xf32>
    %539 = arith.addf %537, %538 : vector<8x1xf32>
    %540 = arith.mulf %539, %190 : vector<8x1xf32>
    %541 = vector.extract_strided_slice %540 {offsets = [0, 0], sizes = [4, 1], strides = [1, 1]} : vector<8x1xf32> to vector<4x1xf32>
    %542 = vector.extract_strided_slice %540 {offsets = [4, 0], sizes = [4, 1], strides = [1, 1]} : vector<8x1xf32> to vector<4x1xf32>
    %543 = arith.addf %541, %542 : vector<4x1xf32>
    %c0_159 = arith.constant 0 : index
    %c5 = arith.constant 5 : index
    %544 = vector.load %arg21[%c0_159, %c5] : memref<4x6xf32, #tpu.memory_space<vmem>>, vector<4x1xf32>
    tpu.vector_store %arg21[%c0_159, %c5], %543 {strides = array<i32>} : memref<4x6xf32, #tpu.memory_space<vmem>>, vector<4x1xf32>,
    return
  }
}

</mosaic_0001>

<bundles_post_ra>
// kernel: squeeze.41
= control target key start
LH: loop header
LB: loop body
LE: loop exit
PB: predicated region body
PF: predicated region fallthrough
CT: control target
= control target key end

     0   :  { %vm11_vm0 = vcmask 31744   ;;  %s129_s0 = inlined_call_operand.vmem [shape: f32[2,1,4,8], index: 0, kind: input, shape index: {}]   ;;  %s130_s1 = inlined_call_operand.vmem [shape: f32[2,4,2,4], index: 1, kind: output, shape index: {}]  }
   0x1   :  { %v79_v0 = vld [vmem:[%s129_s0 + $0x4] sm:$0xf]  ;;  %v8_v1 = vld [vmem:[%s129_s0] sm:$0xf]  ;;  %s88_s0 = smov 124  }
   0x2   :  { %7 = vst [vmem:[#allocation1 + $0x8] sm:$0xf] %v79_v0  ;;  %9 = vst [vmem:[#allocation1] sm:$0xf] %v8_v1 }
   0x9   :  { %v10_v2 = vld [vmem:[#allocation1] sm:$0xf]   ;;  %v14_v3 = vld [vmem:[#allocation1 + $0x8] sm:$0xf]  }
   0xa   :  { %v18_v4 = vld.sshfl [vmem:[#allocation1] sm:$0xff pattern:$0xba983210]   ;;  %12 = vst.msk [vmem:[#allocation0] ss:$8 sm:$0xf] %vm11_vm0, %v10_v2  }
   0xb   :  { %17 = vst.msk [vmem:[#allocation0 + $0x20] ss:$8 sm:$0xf] %vm11_vm0, %v14_v3   ;;  %19 = vrot.lane.b32.xlu0 %v18_v4, %s88_s0 }
  0x7d   :  { %v20_v5 = vpop.permute.xlu0 %19  }
  0x7e   :  { %23 = vst.msk [vmem:[#allocation0 + $0x1] ss:$8 sm:$0xf] %vm11_vm0, %v20_v5   ;;  %25 = vst.msk [vmem:[#allocation0 + $0x1] ss:$8 sm:$0xf0] %vm11_vm0, %v20_v5  }
  0x85   :  { %v29_v6 = vld [vmem:[#allocation0] sm:$0x3]  ;;  %v33_v7 = vld [vmem:[#allocation0 + $0x8] sm:$0x3]  ;;  %v38_v8 = vld [vmem:[#allocation0 + $0x10] sm:$0x3] }
  0x86   :  { %31 = vst [vmem:[%s130_s1] sm:$0x3] %v29_v6  ;;  %80 = vst [vmem:[%s130_s1 + $0x2] sm:$0x3] %v33_v7  ;;  %v44_v9 = vld [vmem:[#allocation0 + $0x18] sm:$0x3] }
  0x87   :  { %81 = vst [vmem:[%s130_s1 + $0x4] sm:$0x3] %v38_v8  ;;  %v50_v10 = vld [vmem:[#allocation0 + $0x20] sm:$0x3]  ;;  %v56_v11 = vld [vmem:[#allocation0 + $0x28] sm:$0x3] }
  0x88   :  { %82 = vst [vmem:[%s130_s1 + $0x6] sm:$0x3] %v44_v9  ;;  %83 = vst [vmem:[%s130_s1 + $0x8] sm:$0x3] %v50_v10  ;;  %v62_v12 = vld [vmem:[#allocation0 + $0x30] sm:$0x3] }
  0x89   :  { %84 = vst [vmem:[%s130_s1 + $0xa] sm:$0x3] %v56_v11  ;;  %v68_v13 = vld [vmem:[#allocation0 + $0x38] sm:$0x3]  ;;  %85 = vst [vmem:[%s130_s1 + $0xc] sm:$0x3] %v62_v12 }
  0x8a   :  { %86 = vst [vmem:[%s130_s1 + $0xe] sm:$0x3] %v68_v13 }

// kernel: complete_model_forward.1
= control target key start
LH: loop header
LB: loop body
LE: loop exit
PB: predicated region body
PF: predicated region fallthrough
CT: control target
= control target key end

     0   :  { %vm124_vm0 = vcmask 64512   ;;  %v4216_v0 = vmov 0.0   ;;  %vm4217_vm1 = vmmov 0   ;;  %v4218_v2 = vmov 0.0|0.0   ;;  %s4221_s29 = smov 112   ;;  %s4223_s23 = smov 16   ;;  %s4922_s1 = inlined_call_operand.vmem [shape: f32[8,8], index: 1, kind: input, shape index: {}]   ;;  %s4923_s3 = inlined_call_operand.vmem [shape: f32[16,32], index: 3, kind: input, shape index: {}]   ;;  %s4924_s0 = inlined_call_operand.vmem [shape: f32[4,8,1], index: 0, kind: input, shape index: {}]   ;;  %s4925_s2 = inlined_call_operand.vmem [shape: f32[1,32], index: 2, kind: input, shape index: {}]   ;;  %s4926_s4 = inlined_call_operand.vmem [shape: f32[1,32], index: 4, kind: input, shape index: {}]   ;;  %s4927_s5 = inlined_call_operand.vmem [shape: f32[3,1,8], index: 5, kind: input, shape index: {}]   ;;  %s4928_s9 = inlined_call_operand.vmem [shape: f32[12,32], index: 9, kind: input, shape index: {}]   ;;  %s4929_s6 = inlined_call_operand.vmem [shape: f32[8,8], index: 6, kind: input, shape index: {}]   ;;  %s4930_s10 = inlined_call_operand.vmem [shape: f32[1,32], index: 10, kind: input, shape index: {}]   ;;  %s4931_s12 = inlined_call_operand.vmem [shape: f32[8,16], index: 12, kind: input, shape index: {}]   ;;  %s4932_s8 = inlined_call_operand.vmem [shape: f32[2,3], index: 8, kind: input, shape index: {}]   ;;  %s4933_s11 = inlined_call_operand.vmem [shape: f32[8,16], index: 11, kind: input, shape index: {}]   ;;  %s4934_s15 = inlined_call_operand.vmem [shape: f32[16,8], index: 15, kind: input, shape index: {}]   ;;  %s4935_s14 = inlined_call_operand.vmem [shape: f32[1,16], index: 14, kind: input, shape index: {}]   ;;  %s4936_s13 = inlined_call_operand.vmem [shape: f32[1,16], index: 13, kind: input, shape index: {}]   ;;  %s4937_s17 = inlined_call_operand.vmem [shape: f32[8,4], index: 17, kind: input, shape index: {}]   ;;  %s4938_s16 = inlined_call_operand.vmem [shape: f32[1,8], index: 16, kind: input, shape index: {}]   ;;  %s4939_s19 = inlined_call_operand.vmem [shape: f32[4,1], index: 19, kind: input, shape index: {}]   ;;  %s4940_s18 = inlined_call_operand.vmem [shape: f32[1,4], index: 18, kind: input, shape index: {}]   ;;  %s4941_s20 = inlined_call_operand.<no memory space> [shape: f32[1,1], index: 20, kind: input, shape index: {}]   ;;  %s4942_s7 = inlined_call_operand.vmem [shape: f32[8,1], index: 7, kind: input, shape index: {}]   ;;  %s4943_s21 = inlined_call_operand.vmem [shape: f32[4,6], index: 21, kind: output, shape index: {}]  }
   0x1   :  { %4947 = sst [smem:[#allocation3_spill]] %s4922_s1  ;;  %3798 = vmatprep.subr.mxu0 %v4216_v0  ;;  %3800 = vmatprep.mubr.msk.f32.mxu0 %vm4217_vm1, %v4216_v0  ;;  %v4219_v6 = vmov 0   ;;  %vm203_vm2 = vcmask 130048   ;;  %s4225_s25 = smov 104   ;;  %vm1066_vm3 = vcmask 1043456   ;;  %vm4226_vm4 = vmmov 1  }
   0x2   :  { %4948 = sst [smem:[#allocation4_spill]] %s4923_s3  ;;  %s4953_s26 = sld [smem:[#allocation3_spill]]  ;;  %3799 = vmatpush3.msra.mxu0 %v4216_v0  ;;  %3807 = vmatprep.mubr.msk.f32.mxu1 %vm4217_vm1, %v4216_v0  ;;  %vm4512_vm5 = vmpackc.low %vm1066_vm3, %vm4226_vm4  ;;  %vm1070_vm6 = vcmask 31744   ;;  %vm1078_vm7 = vcmask 97280   ;;  %vm1514_vm8 = vcmask 3072   ;;  %vm1939_vm9 = vcmask 27672  }
   0x3   :  { %4949 = sst [smem:[#allocation5_spill]] %s4924_s0  ;;  %3810 = vmatprep.subr.mxu0 %v4216_v0  ;;  %4025 = vmatprep.subr.bf16.mxu1 %v4218_v2  ;;  %s4954_s28 = sld [smem:[#allocation4_spill]]  ;;  %vm2357_vm10 = vcmask 11272   ;;  %vm2778_vm11 = vcmask 35872   ;;  %vm3196_vm12 = vcmask 19472   ;;  %vm3617_vm13 = vcmask 44072  }
   0x4   :  { %4950 = sst [smem:[#allocation6_spill]] %s4925_s2  ;;  %4099 = vset.pattern.permute.xlu0 %v4219_v6  ;;  %4100 = vset.pattern.permute.xlu1 %v4219_v6  ;;  %s4955_s22 = sld [smem:[#allocation5_spill]] }
   0x5   :  { %4951 = sst [smem:[#allocation7_spill]] %s4926_s4  ;;  %s4220_s4 = smov 8  }
   0x6   :  { %4952 = sst [smem:[#allocation8_spill]] %s4927_s5  ;;  %s4956_s24 = sld [smem:[#allocation6_spill]] }
   0x7   :  { %s4222_s5 = smov 120   ;;  %s4224_s0 = smov 24  }
   0x8   :  { %v4352_v1 = vld [vmem:[%s4953_s26] sm:$0xff]  ;;  %s4957_s26 = sld [smem:[#allocation7_spill]]  ;;  %s4228_s1 = smov 108  }
   0x9   :  { %3801 = vmatmul.mubr.msk.f32.vlgmr.msra.gmra.mrb[0].mxu0 %vm124_vm0, %v4352_v1  ;;  %v71_v3 = vld [vmem:[%s4954_s28] sm:$0xff]  ;;  %v72_v4 = vld [vmem:[%s4954_s28 + $0x8] sm:$0xff]  ;;  %s4958_s28 = sld [smem:[#allocation8_spill]] }
   0xa   :  { %3812 = vmatprep.mubr.msk.f32.mxu0 %vm4217_vm1, %v4216_v0  ;;  %v4369_v5 = vpack.c.bf16 %v72_v4, %v71_v3  ;;  %v78_v9 = vld [vmem:[%s4955_s22] sm:$0xff]  ;;  %v79_v53 = vld [vmem:[%s4955_s22 + $0x8] sm:$0xff] }
   0xc   :  { %4027 = vmatpush3.bf16.msra.mxu1 %v4369_v5  ;;  %v4386_v12 = vld [vmem:[%s4956_s24] ss:$0 sm:$0xff] }
   0xd   :  { %4028 = vmatprep.subr.bf16.mxu1 %v4218_v2 }
   0xe   :  { %v4392_v15 = vld [vmem:[%s4957_s26] ss:$0 sm:$0xff] }
   0xf   :  { %v4398_v20 = vld [vmem:[%s4958_s28 + $0x1] ss:$0 sm:$0xff]  ;;  %v4406_v23 = vld [vmem:[%s4958_s28] ss:$0 sm:$0xff]  ;;  %v4419_v42 = vld [vmem:[%s4958_s28 + $0x2] ss:$0 sm:$0xff] }
  0x10   :  { %v297_v22 = vmul.f32 0.0, %v4398_v20  ;;  %v283_v24 = vmul.f32 0.0, %v4406_v23  ;;  %s4235_s28 = smov 5  }
  0xdc   :  { %v194_v7 = vpop.f32.mrb[0].mxu0 }
  0xdd   :  { %199 = vrot.lane.b32.xlu0 %v194_v7, %s4220_s4  ;;  %v3802_v8 = vpop.f32.mrb[1].mxu0 }
  0xe1   :  { %85 = vperm.xlu0 %4099, %v78_v9  }
 0x14f   :  { %v200_v10 = vpop.permute.xlu0 %199 }
 0x150   :  { %v202_v11 = vsel %vm124_vm0, 0.0, %v200_v10 }
 0x151   :  { %3808 = vmatmul.mubr.msk.f32.vlgmr.msra.gmra.mrb[0].mxu1 %vm203_vm2, %v202_v11 }
 0x152   :  { %4030 = vmatpush3.bf16.msra.mxu1 %v4369_v5  ;;  %3819 = vmatprep.mubr.msk.f32.mxu1 %vm4217_vm1, %v4216_v0 }
 0x153   :  { %4031 = vmatprep.subr.bf16.mxu1 %v4218_v2 }
 0x160   :  { %v86_v13 = vpop.permute.xlu0 %85 }
 0x161   :  { %v109_v14 = vmul.f32 %v4386_v12, %v86_v13 }
 0x163   :  { %v120_v16 = vadd.f32 %v4392_v15, %v109_v14 }
 0x224   :  { %v273_v17 = vpop.f32.mrb[0].mxu1 }
 0x225   :  { %v274_v18 = vadd.f32 %v273_v17, %v120_v16  ;;  %v3809_v19 = vpop.f32.mrb[1].mxu1 }
 0x227   :  { %4104 = vtanh.f32 %v274_v18  ;;  %v284_v25 = vadd.f32 %v283_v24, %v274_v18 }
 0x229   :  { %v3630_v26 = vmul.f32 -1.442695, %v284_v25 }
 0x22b   :  { %4106 = vpow2.f32 %v3630_v26 }
 0x231   :  { %v4105_v21 = vpop.eup %4104 }
 0x232   :  { %312 = vrot.lane.b32.xlu1 %v4105_v21, %s4221_s29 }
 0x235   :  { %v4107_v27 = vpop.eup %4106 }
 0x236   :  { %299 = vrot.lane.b32.xlu1 %v297_v22, %s4220_s4  ;;  %v288_v28 = vadd.f32 1.0, %v4107_v27 }
 0x238   :  { %4108 = vrcp.f32 %v288_v28 }
 0x242   :  { %v4109_v29 = vpop.eup %4108 }
 0x2a4   :  { %v313_v30 = vpop.permute.xlu1 %312 }
 0x2a5   :  { %v315_v31 = vmul.f32 %v4109_v29, %v313_v30 }
 0x2a7   :  { %317 = vrot.lane.b32.xlu1 %v315_v31, %s4220_s4 }
 0x2a8   :  { %v300_v32 = vpop.permute.xlu1 %299 }
 0x2a9   :  { %v302_v33 = vadd.f32 %v300_v32, %v274_v18 }
 0x2ab   :  { %v3632_v34 = vmul.f32 -1.442695, %v302_v33 }
 0x2ad   :  { %4110 = vpow2.f32 %v3632_v34 }
 0x2b7   :  { %v4111_v35 = vpop.eup %4110 }
 0x2b8   :  { %v306_v36 = vadd.f32 1.0, %v4111_v35 }
 0x2ba   :  { %4112 = vrcp.f32 %v306_v36 }
 0x2c4   :  { %v4113_v37 = vpop.eup %4112 }
 0x2c5   :  { %v310_v38 = vmul.f32 0.0, %v4113_v37 }
 0x319   :  { %v318_v39 = vpop.permute.xlu1 %317 }
 0x31a   :  { %v4410_v40 = vadd.f32 %v318_v39, %v310_v38  ;;  %v80_v39 = vld [vmem:[%s4955_s22 + $0x10] sm:$0xff] }
 0x31c   :  { %4114 = vtanh.f32 %v4410_v40  ;;  %328 = vrot.lane.b32.xlu0 %v4410_v40, %s4222_s5 }
 0x326   :  { %v4115_v41 = vpop.eup %4114 }
 0x327   :  { %345 = vrot.lane.b32.xlu0 %v4115_v41, %s4223_s23 }
 0x38e   :  { %v329_v43 = vpop.permute.xlu0 %328 }
 0x38f   :  { %v331_v44 = vmul.f32 %v4419_v42, %v329_v43  ;;  %v509_v54 = vmul.f32 %v4398_v20, %v329_v43  ;;  %v501_v7 = vmul.f32 %v4406_v23, %v329_v43 }
 0x391   :  { %333 = vrot.lane.b32.xlu1 %v331_v44, %s4224_s0 }
 0x399   :  { %v346_v51 = vpop.permute.xlu0 %345 }
 0x403   :  { %v334_v45 = vpop.permute.xlu1 %333 }
 0x404   :  { %v336_v46 = vadd.f32 %v334_v45, %v274_v18 }
 0x406   :  { %v3634_v47 = vmul.f32 -1.442695, %v336_v46 }
 0x408   :  { %4116 = vpow2.f32 %v3634_v47 }
 0x412   :  { %v4117_v48 = vpop.eup %4116 }
 0x413   :  { %v340_v49 = vadd.f32 1.0, %v4117_v48 }
 0x415   :  { %4118 = vrcp.f32 %v340_v49 }
 0x41f   :  { %v4119_v50 = vpop.eup %4118 }
 0x420   :  { %v348_v52 = vmul.f32 %v4119_v50, %v346_v51 }
 0x422   :  { %350 = vrot.lane.b32.xlu1 %v348_v52, %s4225_s25 }
 0x426   :  { %90 = vperm.xlu1 %4100, %v79_v53  }
 0x42a   :  { %511 = vrot.lane.b32.xlu1 %v509_v54, %s4220_s4 }
 0x494   :  { %v351_v55 = vpop.permute.xlu1 %350 }
 0x495   :  { %3811 = vmatpush3.msra.mxu0 %v351_v55 }
 0x496   :  { %3813 = vmatmul.mubr.msk.f32.vlgmr.msra.gmra.mrb[2].mxu0 %vm124_vm0, %v4352_v1  ;;  %3822 = vmatprep.subr.mxu0 %v4216_v0 }
 0x497   :  { %3824 = vmatprep.mubr.msk.f32.mxu0 %vm4217_vm1, %v4216_v0 }
 0x4a5   :  { %v91_v60 = vpop.permute.xlu1 %90 }
 0x4a6   :  { %v110_v61 = vmul.f32 %v4386_v12, %v91_v60 }
 0x4a8   :  { %v121_v62 = vadd.f32 %v4392_v15, %v110_v61 }
 0x4a9   :  { %v512_v17 = vpop.permute.xlu1 %511 }
 0x569   :  { %v419_v56 = vpop.f32.mrb[2].mxu0 }
 0x56a   :  { %424 = vrot.lane.b32.xlu0 %v419_v56, %s4220_s4  ;;  %v3814_v57 = vpop.f32.mrb[3].mxu0 }
 0x5dc   :  { %v425_v58 = vpop.permute.xlu0 %424 }
 0x5dd   :  { %v427_v59 = vsel %vm124_vm0, %v351_v55, %v425_v58 }
 0x5de   :  { %3820 = vmatmul.mubr.msk.f32.vlgmr.msra.gmra.mrb[2].mxu1 %vm203_vm2, %v427_v59 }
 0x5df   :  { %4033 = vmatpush3.bf16.msra.mxu1 %v4369_v5  ;;  %3831 = vmatprep.mubr.msk.f32.mxu1 %vm4217_vm1, %v4216_v0 }
 0x5e0   :  { %4034 = vmatprep.subr.bf16.mxu1 %v4218_v2 }
 0x6b1   :  { %v497_v63 = vpop.f32.mrb[2].mxu1 }
 0x6b2   :  { %v498_v3 = vadd.f32 %v497_v63, %v121_v62  ;;  %v3821_v4 = vpop.f32.mrb[3].mxu1 }
 0x6b4   :  { %4120 = vtanh.f32 %v498_v3  ;;  %v502_v8 = vadd.f32 %v501_v7, %v498_v3  ;;  %v514_v18 = vadd.f32 %v512_v17, %v498_v3 }
 0x6b6   :  { %v3637_v9 = vmul.f32 -1.442695, %v502_v8  ;;  %v3638_v19 = vmul.f32 -1.442695, %v514_v18 }
 0x6b8   :  { %4122 = vpow2.f32 %v3637_v9 }
 0x6be   :  { %v4121_v6 = vpop.eup %4120 }
 0x6bf   :  { %524 = vrot.lane.b32.xlu0 %v4121_v6, %s4221_s29 }
 0x6c2   :  { %v4123_v10 = vpop.eup %4122 }
 0x6c3   :  { %v506_v11 = vadd.f32 1.0, %v4123_v10 }
 0x6c5   :  { %4124 = vrcp.f32 %v506_v11 }
 0x6c6   :  { %4126 = vpow2.f32 %v3638_v19 }
 0x6cf   :  { %v4125_v13 = vpop.eup %4124 }
 0x6d0   :  { %v4127_v21 = vpop.eup %4126 }
 0x6d1   :  { %v518_v22 = vadd.f32 1.0, %v4127_v21 }
 0x6d3   :  { %4128 = vrcp.f32 %v518_v22 }
 0x6dd   :  { %v4129_v24 = vpop.eup %4128 }
 0x6de   :  { %v522_v25 = vmul.f32 %v4129_v24, %v4410_v40 }
 0x731   :  { %v525_v14 = vpop.permute.xlu0 %524 }
 0x732   :  { %v527_v16 = vmul.f32 %v4125_v13, %v525_v14 }
 0x734   :  { %529 = vrot.lane.b32.xlu0 %v527_v16, %s4220_s4 }
 0x7a6   :  { %v530_v26 = vpop.permute.xlu0 %529 }
 0x7a7   :  { %v4447_v27 = vadd.f32 %v530_v26, %v522_v25  ;;  %v81_v25 = vld [vmem:[%s4955_s22 + $0x18] sm:$0xff] }
 0x7a9   :  { %4130 = vtanh.f32 %v4447_v27  ;;  %534 = vrot.lane.b32.xlu1 %v4447_v27, %s4222_s5 }
 0x7b3   :  { %v4131_v28 = vpop.eup %4130 }
 0x7b4   :  { %551 = vrot.lane.b32.xlu1 %v4131_v28, %s4223_s23 }
 0x81b   :  { %v535_v29 = vpop.permute.xlu1 %534 }
 0x81c   :  { %v537_v30 = vmul.f32 %v4419_v42, %v535_v29  ;;  %v715_v40 = vmul.f32 %v4398_v20, %v535_v29  ;;  %v707_v54 = vmul.f32 %v4406_v23, %v535_v29 }
 0x81e   :  { %539 = vrot.lane.b32.xlu0 %v537_v30, %s4224_s0  ;;  %v968_v30 = vld [vmem:[%s4928_s9 + $0x8] sm:$0xf] }
 0x826   :  { %v552_v37 = vpop.permute.xlu1 %551 }
 0x890   :  { %v540_v31 = vpop.permute.xlu0 %539 }
 0x891   :  { %v542_v32 = vadd.f32 %v540_v31, %v498_v3 }
 0x893   :  { %v3639_v33 = vmul.f32 -1.442695, %v542_v32 }
 0x895   :  { %4132 = vpow2.f32 %v3639_v33  ;;  %v4519_v33 = vld [vmem:[%s4929_s6] sm:$0xff]  ;;  %s4232_s6 = smov 2  }
 0x89f   :  { %v4133_v34 = vpop.eup %4132 }
 0x8a0   :  { %v546_v35 = vadd.f32 1.0, %v4133_v34 }
 0x8a2   :  { %4134 = vrcp.f32 %v546_v35  ;;  %v1071_v35 = vsel %vm1070_vm6, %v4519_v33, 0.0 }
 0x8ac   :  { %v4135_v36 = vpop.eup %4134 }
 0x8ad   :  { %v554_v38 = vmul.f32 %v4135_v36, %v552_v37 }
 0x8af   :  { %556 = vrot.lane.b32.xlu0 %v554_v38, %s4225_s25 }
 0x8b3   :  { %95 = vperm.xlu0 %4099, %v80_v39  }
 0x8b7   :  { %717 = vrot.lane.b32.xlu0 %v715_v40, %s4220_s4 }
 0x921   :  { %v557_v41 = vpop.permute.xlu0 %556 }
 0x922   :  { %3823 = vmatpush3.msra.mxu0 %v557_v41 }
 0x923   :  { %3825 = vmatmul.mubr.msk.f32.vlgmr.msra.gmra.mrb[4].mxu0 %vm124_vm0, %v4352_v1  ;;  %3834 = vmatprep.subr.mxu0 %v4216_v0 }
 0x924   :  { %3836 = vmatprep.mubr.msk.f32.mxu0 %vm4217_vm1, %v4216_v0 }
 0x932   :  { %v96_v47 = vpop.permute.xlu0 %95 }
 0x933   :  { %v111_v48 = vmul.f32 %v4386_v12, %v96_v47 }
 0x935   :  { %v122_v49 = vadd.f32 %v4392_v15, %v111_v48 }
 0x936   :  { %v718_v61 = vpop.permute.xlu0 %717 }
 0x9f6   :  { %v625_v43 = vpop.f32.mrb[4].mxu0 }
 0x9f7   :  { %630 = vrot.lane.b32.xlu1 %v625_v43, %s4220_s4  ;;  %v3826_v44 = vpop.f32.mrb[5].mxu0  ;;  %v4539_v43 = vld [vmem:[%s4930_s10] ss:$0 sm:$0xff] }
 0xa69   :  { %v631_v45 = vpop.permute.xlu1 %630 }
 0xa6a   :  { %v633_v46 = vsel %vm124_vm0, %v557_v41, %v631_v45 }
 0xa6b   :  { %3832 = vmatmul.mubr.msk.f32.vlgmr.msra.gmra.mrb[4].mxu1 %vm203_vm2, %v633_v46 }
 0xa6c   :  { %4036 = vmatpush3.bf16.msra.mxu1 %v4369_v5  ;;  %3843 = vmatprep.mubr.msk.f32.mxu1 %vm4217_vm1, %v4216_v0 }
 0xa6d   :  { %4037 = vmatprep.subr.bf16.mxu1 %v4218_v2 }
 0xb3e   :  { %v703_v50 = vpop.f32.mrb[4].mxu1 }
 0xb3f   :  { %v704_v51 = vadd.f32 %v703_v50, %v122_v49  ;;  %v3833_v52 = vpop.f32.mrb[5].mxu1 }
 0xb41   :  { %4136 = vtanh.f32 %v704_v51  ;;  %v708_v5 = vadd.f32 %v707_v54, %v704_v51  ;;  %v720_v62 = vadd.f32 %v718_v61, %v704_v51 }
 0xb43   :  { %v3642_v55 = vmul.f32 -1.442695, %v708_v5  ;;  %v3643_v63 = vmul.f32 -1.442695, %v720_v62 }
 0xb45   :  { %4138 = vpow2.f32 %v3642_v55 }
 0xb4b   :  { %v4137_v53 = vpop.eup %4136 }
 0xb4c   :  { %730 = vrot.lane.b32.xlu1 %v4137_v53, %s4221_s29 }
 0xb4f   :  { %v4139_v56 = vpop.eup %4138 }
 0xb50   :  { %v712_v57 = vadd.f32 1.0, %v4139_v56 }
 0xb52   :  { %4140 = vrcp.f32 %v712_v57 }
 0xb53   :  { %4142 = vpow2.f32 %v3643_v63 }
 0xb5c   :  { %v4141_v58 = vpop.eup %4140 }
 0xb5d   :  { %v4143_v3 = vpop.eup %4142 }
 0xb5e   :  { %v724_v4 = vadd.f32 1.0, %v4143_v3 }
 0xb60   :  { %4144 = vrcp.f32 %v724_v4 }
 0xb6a   :  { %v4145_v6 = vpop.eup %4144 }
 0xb6b   :  { %v728_v7 = vmul.f32 %v4145_v6, %v4447_v27 }
 0xbbe   :  { %v731_v59 = vpop.permute.xlu1 %730 }
 0xbbf   :  { %v733_v60 = vmul.f32 %v4141_v58, %v731_v59 }
 0xbc1   :  { %735 = vrot.lane.b32.xlu1 %v733_v60, %s4220_s4 }
 0xc33   :  { %v736_v8 = vpop.permute.xlu1 %735 }
 0xc34   :  { %v4479_v9 = vadd.f32 %v736_v8, %v728_v7 }
 0xc36   :  { %4146 = vtanh.f32 %v4479_v9  ;;  %740 = vrot.lane.b32.xlu0 %v4479_v9, %s4222_s5 }
 0xc40   :  { %v4147_v10 = vpop.eup %4146 }
 0xc41   :  { %757 = vrot.lane.b32.xlu0 %v4147_v10, %s4223_s23 }
 0xca8   :  { %v4485_v11 = vpop.permute.xlu0 %740 }
 0xca9   :  { %v743_v13 = vmul.f32 %v4419_v42, %v4485_v11  ;;  %v921_v26 = vmul.f32 %v4398_v20, %v4485_v11  ;;  %v967_v20 = vld [vmem:[%s4928_s9] sm:$0xff] }
 0xcaa   :  { %v4509_v31 = vpack.c.bf16 %v968_v30, %v967_v20  ;;  %v4571_v20 = vld [vmem:[%s4933_s11] sm:$0xff] }
 0xcab   :  { %745 = vrot.lane.b32.xlu1 %v743_v13, %s4224_s0 }
 0xcb3   :  { %v758_v22 = vpop.permute.xlu0 %757 }
 0xd1d   :  { %v746_v14 = vpop.permute.xlu1 %745 }
 0xd1e   :  { %v748_v16 = vadd.f32 %v746_v14, %v704_v51 }
 0xd20   :  { %v3644_v17 = vmul.f32 -1.442695, %v748_v16 }
 0xd22   :  { %4148 = vpow2.f32 %v3644_v17  ;;  %v980_v17 = vld [vmem:[%s4931_s12] sm:$0xff] }
 0xd2c   :  { %v4149_v18 = vpop.eup %4148 }
 0xd2d   :  { %v752_v19 = vadd.f32 1.0, %v4149_v18 }
 0xd2f   :  { %4150 = vrcp.f32 %v752_v19 }
 0xd39   :  { %v4151_v21 = vpop.eup %4150 }
 0xd3a   :  { %v760_v24 = vmul.f32 %v4151_v21, %v758_v22 }
 0xd3c   :  { %762 = vrot.lane.b32.xlu1 %v760_v24, %s4225_s25 }
 0xd40   :  { %100 = vperm.xlu1 %4100, %v81_v25  }
 0xd44   :  { %923 = vrot.lane.b32.xlu1 %v921_v26, %s4220_s4 }
 0xdae   :  { %v763_v27 = vpop.permute.xlu1 %762 }
 0xdaf   :  { %3835 = vmatpush3.msra.mxu0 %v763_v27 }
 0xdb0   :  { %3837 = vmatmul.mubr.msk.f32.vlgmr.msra.gmra.mrb[6].mxu0 %vm124_vm0, %v4352_v1  ;;  %3846 = vmatprep.subr.mxu0 %v4216_v0 }
 0xdb1   :  { %3848 = vmatprep.mubr.msk.f32.mxu0 %vm4217_vm1, %v4216_v0  ;;  %3847 = vmatpush3.msra.mxu0 %v980_v17 }
 0xdb2   :  { %3858 = vmatprep.subr.mxu0 %v4216_v0 }
 0xdbf   :  { %v101_v36 = vpop.permute.xlu1 %100 }
 0xdc0   :  { %v112_v37 = vmul.f32 %v4386_v12, %v101_v36  ;;  %v1261_v36 = vlaneseq }
 0xdc2   :  { %v123_v38 = vadd.f32 %v4392_v15, %v112_v37  ;;  %v913_v15 = vmul.f32 %v4406_v23, %v4485_v11  ;;  %v1262_v37 = vshrl.u32 %v1261_v36, 7 }
 0xdc3   :  { %v924_v57 = vpop.permute.xlu1 %923 }
 0xe83   :  { %v831_v28 = vpop.f32.mrb[6].mxu0 }
 0xe84   :  { %836 = vrot.lane.b32.xlu0 %v831_v28, %s4220_s4  ;;  %v3838_v29 = vpop.f32.mrb[7].mxu0 }
 0xe85   :  { %v1179_v29 = vld [vmem:[%s4932_s8] sm:$0x1] }
 0xef6   :  { %v837_v1 = vpop.permute.xlu0 %836 }
 0xef7   :  { %v839_v34 = vsel %vm124_vm0, %v763_v27, %v837_v1 }
 0xef8   :  { %3844 = vmatmul.mubr.msk.f32.vlgmr.msra.gmra.mrb[6].mxu1 %vm203_vm2, %v839_v34  ;;  %v973_v34 = vld [vmem:[%s4934_s15 + $0x8] sm:$0xff] }
 0xef9   :  { %4040 = vmatpush3.bf16.msk.msra.mxu1 %vm4512_vm5, %v4509_v31  ;;  %3855 = vmatprep.mubr.msk.f32.mxu1 %vm4217_vm1, %v4216_v0 }
 0xefa   :  { %4041 = vmatprep.subr.bf16.mxu1 %v4218_v2 }
 0xefc   :  { %3856 = vmatmul.mubr.msk.f32.vlgmr.msra.gmra.mrb[8].mxu1 %vm1078_vm7, %v1071_v35 }
 0xefd   :  { %3867 = vmatprep.mubr.msk.f32.mxu1 %vm4217_vm1, %v4216_v0 }
 0xfcb   :  { %v909_v39 = vpop.f32.mrb[6].mxu1 }
 0xfcc   :  { %v910_v40 = vadd.f32 %v909_v39, %v123_v38  ;;  %v3845_v41 = vpop.f32.mrb[7].mxu1  ;;  %v3650_v38 = vld [vmem:[%s4935_s14] ss:$0 sm:$0xff] }
 0xfcd   :  { %v4597_v39 = vld [vmem:[%s4936_s13] sm:$0x1] }
 0xfce   :  { %4152 = vtanh.f32 %v910_v40  ;;  %v914_v48 = vadd.f32 %v913_v15, %v910_v40  ;;  %v926_v60 = vadd.f32 %v924_v57, %v910_v40 }
 0xfcf   :  { %v1151_v44 = vpop.f32.mrb[8].mxu1 }
 0xfd0   :  { %v3857_v45 = vpop.f32.mrb[9].mxu1  ;;  %v1152_v46 = vadd.f32 %v4539_v43, %v1151_v44  ;;  %v3647_v49 = vmul.f32 -1.442695, %v914_v48  ;;  %v3648_v61 = vmul.f32 -1.442695, %v926_v60 }
 0xfd2   :  { %4154 = vtanh.f32 %v1152_v46  ;;  %v3655_v50 = vmul.f32 -1.442695, %v1152_v46  ;;  %v4599_v46 = vsub.s32 0, %v1262_v37  ;;  %v1621_v37 = vld [vmem:[%s4932_s8 + $0x1] sm:$0x1] }
 0xfd3   :  { %4156 = vpow2.f32 %v3647_v49 }
 0xfd4   :  { %4158 = vpow2.f32 %v3655_v50 }
 0xfd8   :  { %v4153_v47 = vpop.eup %4152 }
 0xfd9   :  { %936 = vrot.lane.b32.xlu0 %v4153_v47, %s4221_s29 }
 0xfdc   :  { %v4155_v12 = vpop.eup %4154 }
 0xfdd   :  { %1164 = vrot.lane.b32.xlu1 %v4155_v12, %s4221_s29  ;;  %v4157_v51 = vpop.eup %4156 }
 0xfde   :  { %v918_v52 = vadd.f32 1.0, %v4157_v51  ;;  %v4159_v53 = vpop.eup %4158 }
 0xfdf   :  { %v1158_v54 = vadd.f32 1.0, %v4159_v53 }
 0xfe0   :  { %4160 = vrcp.f32 %v918_v52 }
 0xfe1   :  { %4162 = vrcp.f32 %v1158_v54 }
 0xfe2   :  { %4164 = vpow2.f32 %v3648_v61 }
 0xfea   :  { %v4161_v5 = vpop.eup %4160 }
 0xfeb   :  { %v4163_v58 = vpop.eup %4162 }
 0xfec   :  { %v4165_v62 = vpop.eup %4164  ;;  %v1162_v11 = vmul.f32 0.0, %v4163_v58 }
 0xfed   :  { %v930_v63 = vadd.f32 1.0, %v4165_v62  ;;  %v4642_v62 = vld [vmem:[%s4939_s19] sm:$0xf] }
 0xfef   :  { %4166 = vrcp.f32 %v930_v63  ;;  %v4650_v63 = vld [vmem:[%s4940_s18] ss:$0 sm:$0xff] }
 0xff9   :  { %v4167_v3 = vpop.eup %4166 }
 0xffa   :  { %v934_v4 = vmul.f32 %v4167_v3, %v4479_v9 }
0x104b   :  { %v937_v55 = vpop.permute.xlu0 %936 }
0x104c   :  { %v939_v56 = vmul.f32 %v4161_v5, %v937_v55  ;;  %v4616_v5 = vld [vmem:[%s4937_s17] sm:$0xff] }
0x104d   :  { %v4623_v55 = vld [vmem:[%s4938_s16] ss:$0 sm:$0xff] }
0x104e   :  { %941 = vrot.lane.b32.xlu0 %v939_v56, %s4220_s4 }
0x104f   :  { %v1165_v59 = vpop.permute.xlu1 %1164 }
0x1050   :  { %v1167_v23 = vmul.f32 %v4163_v58, %v1165_v59 }
0x1052   :  { %1169 = vrot.lane.b32.xlu1 %v1167_v23, %s4220_s4 }
0x10c0   :  { %v942_v6 = vpop.permute.xlu0 %941 }
0x10c1   :  { %v944_v7 = vadd.f32 %v942_v6, %v934_v4 }
0x10c3   :  { %4168 = vtanh.f32 %v944_v7  ;;  %946 = vrot.lane.b32.xlu0 %v944_v7, %s4222_s5  ;;  %s4227_s5 = smov 124  }
0x10c4   :  { %v1170_v10 = vpop.permute.xlu1 %1169 }
0x10c5   :  { %v4551_v13 = vadd.f32 %v1170_v10, %v1162_v11 }
0x10c7   :  { %4170 = vtanh.f32 %v4551_v13 }
0x10cd   :  { %v4169_v8 = vpop.eup %4168 }
0x10ce   :  { %963 = vrot.lane.b32.xlu1 %v4169_v8, %s4223_s23 }
0x10d1   :  { %v4171_v9 = vpop.eup %4170 }
0x1135   :  { %v947_v14 = vpop.permute.xlu0 %946 }
0x1136   :  { %v949_v16 = vmul.f32 %v4419_v42, %v947_v14  ;;  %v26_v14 = vstv %s4941_s20 }
0x1137   :  { %27 = vst [vmem:[#allocation2] sm:$0x1] %v26_v14 }
0x1138   :  { %951 = vrot.lane.b32.xlu0 %v949_v16, %s4224_s0 }
0x113c   :  { %1175 = vrot.lane.b32.xlu0 %v4171_v9, %s4223_s23 }
0x1140   :  { %v964_v27 = vpop.permute.xlu1 %963 }
0x11aa   :  { %v952_v18 = vpop.permute.xlu0 %951 }
0x11ab   :  { %v954_v19 = vadd.f32 %v952_v18, %v910_v40 }
0x11ad   :  { %v3649_v21 = vmul.f32 -1.442695, %v954_v19 }
0x11ae   :  { %v1176_v22 = vpop.permute.xlu0 %1175 }
0x11af   :  { %4172 = vpow2.f32 %v3649_v21  ;;  %v1178_v24 = vmul.f32 %v4163_v58, %v1176_v22 }
0x11b1   :  { %1181 = vrot.lane.b32.xlu0 %v1178_v24, %s4225_s25 }
0x11b5   :  { %1517 = vrot.lane.b32.xlu0 %v4519_v33, %s4227_s5  ;;  %v972_v33 = vld [vmem:[%s4934_s15] sm:$0xff] }
0x11b6   :  { %v4587_v35 = vpack.c.bf16 %v973_v34, %v972_v33 }
0x11b8   :  { %4043 = vmatpush3.bf16.msra.mxu1 %v4587_v35 }
0x11b9   :  { %v4173_v42 = vpop.eup %4172  ;;  %3875 = vmatprep.subr.mxu1 %v4216_v0 }
0x11ba   :  { %v958_v25 = vadd.f32 1.0, %v4173_v42  ;;  %v4672_v42 = vld [vmem:[%s4942_s7] sm:$0xff] }
0x11bc   :  { %4174 = vrcp.f32 %v958_v25 }
0x11c6   :  { %v4175_v26 = vpop.eup %4174 }
0x11c7   :  { %v966_v28 = vmul.f32 %v4175_v26, %v964_v27 }
0x11c9   :  { %989 = vrot.lane.b32.xlu1 %v966_v28, %s4225_s25 }
0x11cd   :  { %1257 = vperm.xlu1 %4100, %v1179_v29  }
0x11d1   :  { %1520 = vrot.lane.b32.xlu1 %v1178_v24, %s4228_s1  ;;  %v4667_v24 = vld [vmem:[#allocation2] ss:$0 sm:$0xff] }
0x1223   :  { %v1182_v1 = vpop.permute.xlu0 %1181 }
0x1227   :  { %v1518_v23 = vpop.permute.xlu0 %1517 }
0x123b   :  { %v990_v30 = vpop.permute.xlu1 %989 }
0x123c   :  { %3849 = vmatmul.mubr.msk.f32.vlgmr.msra.gmra.mrb[8].mxu0 %vm124_vm0, %v990_v30 }
0x123d   :  { %3859 = vmatpush3.msra.mxu0 %v4571_v20  ;;  %3860 = vmatprep.mubr.msk.f32.mxu0 %vm4217_vm1, %v4216_v0 }
0x123e   :  { %3870 = vmatprep.subr.mxu0 %v4216_v0 }
0x1240   :  { %3861 = vmatmul.mubr.msk.f32.vlgmr.msra.gmra.mrb[10].mxu0 %vm124_vm0, %v1182_v1 }
0x1241   :  { %3872 = vmatprep.mubr.msk.f32.mxu0 %vm4217_vm1, %v4216_v0  ;;  %3871 = vmatpush3.msra.mxu0 %v4616_v5 }
0x1242   :  { %4044 = vmatprep.subr.bf16.mxu0 %v4218_v2 }
0x124c   :  { %v1258_v40 = vpop.permute.xlu1 %1257 }
0x124d   :  { %v1260_v47 = vmul.f32 %v1258_v40, %v4597_v39 }
0x124f   :  { %v1264_v51 = vrot.slane %v1260_v47, %v4599_v46 }
0x1250   :  { %v1521_v60 = vpop.permute.xlu1 %1520 }
0x1251   :  { %v1523_v61 = vsel %vm1070_vm6, %v1518_v23, %v1521_v60 }
0x130f   :  { %v1059_v41 = vpop.f32.mrb[8].mxu0 }
0x1310   :  { %v1060_v44 = vadd.f32 %v3650_v38, %v1059_v41  ;;  %v3850_v45 = vpop.f32.mrb[9].mxu0 }
0x1312   :  { %v1064_v12 = vrot.slane %v1060_v44, 4 }
0x1313   :  { %v1251_v15 = vpop.f32.mrb[10].mxu0 }
0x1314   :  { %v4603_v48 = vsel %vm1066_vm3, %v1060_v44, %v1064_v12  ;;  %v3862_v49 = vpop.f32.mrb[11].mxu0  ;;  %v4606_v50 = vsel %vm1066_vm3, %v1064_v12, %v1060_v44 }
0x1315   :  { %v1252_v52 = vadd.f32 %v1251_v15, %v4603_v48 }
0x1317   :  { %v1265_v53 = vadd.f32 %v1264_v51, %v1252_v52 }
0x1319   :  { %v1266_v54 = vmax.f32 %v1265_v53, 0.0 }
0x131b   :  { %3868 = vmatmul.mubr.msk.f32.vlgmr.msra.gmra.mrb[10].mxu1 %vm203_vm2, %v1266_v54 }
0x131c   :  { %3877 = vmatprep.mubr.msk.f32.mxu1 %vm4217_vm1, %v4216_v0  ;;  %3876 = vmatpush3.msk.msra.mxu1 %vm1066_vm3, %v4642_v62 }
0x131d   :  { %3887 = vmatprep.subr.mxu1 %v4216_v0 }
0x13ee   :  { %v1342_v56 = vpop.f32.mrb[10].mxu1 }
0x13ef   :  { %v1343_v57 = vadd.f32 %v4623_v55, %v1342_v56  ;;  %v3869_v58 = vpop.f32.mrb[11].mxu1 }
0x13f1   :  { %v1346_v59 = vmax.f32 %v1343_v57, 0.0 }
0x13f3   :  { %3873 = vmatmul.mubr.msk.f32.vlgmr.msra.gmra.mrb[12].mxu0 %vm124_vm0, %v1346_v59 }
0x13f4   :  { %4047 = vmatpush3.bf16.msk.msra.mxu0 %vm4512_vm5, %v4509_v31  ;;  %3884 = vmatprep.mubr.msk.f32.mxu0 %vm4217_vm1, %v4216_v0 }
0x13f5   :  { %4048 = vmatprep.subr.bf16.mxu0 %v4218_v2 }
0x13f7   :  { %3885 = vmatmul.mubr.msk.f32.vlgmr.msra.gmra.mrb[14].mxu0 %vm1078_vm7, %v1523_v61 }
0x13f8   :  { %4050 = vmatpush3.bf16.msra.mxu0 %v4587_v35  ;;  %3896 = vmatprep.mubr.msk.f32.mxu0 %vm4217_vm1, %v4216_v0 }
0x13f9   :  { %3904 = vmatprep.subr.mxu0 %v4216_v0 }
0x14c6   :  { %v1422_v3 = vpop.f32.mrb[12].mxu0 }
0x14c7   :  { %v4653_v4 = vadd.f32 %v4650_v63, %v1422_v3  ;;  %v3874_v6 = vpop.f32.mrb[13].mxu0 }
0x14c9   :  { %v1426_v7 = vmax.f32 %v4653_v4, 0.0  ;;  %v1941_v57 = vsel %vm1070_vm6, %v4653_v4, 0.0 }
0x14ca   :  { %v1593_v8 = vpop.f32.mrb[14].mxu0 }
0x14cb   :  { %v1594_v10 = vadd.f32 %v4539_v43, %v1593_v8  ;;  %3878 = vmatmul.mubr.msk.f32.vlgmr.msra.gmra.mrb[12].mxu1 %vm1070_vm6, %v1426_v7  ;;  %v3886_v11 = vpop.f32.mrb[15].mxu0 }
0x14cc   :  { %3888 = vmatpush3.msra.mxu1 %v4571_v20  ;;  %3889 = vmatprep.mubr.msk.f32.mxu1 %vm4217_vm1, %v4216_v0 }
0x14cd   :  { %4176 = vtanh.f32 %v1594_v10  ;;  %3899 = vmatprep.subr.mxu1 %v4216_v0  ;;  %v3666_v9 = vmul.f32 -1.442695, %v1594_v10 }
0x14cf   :  { %4178 = vpow2.f32 %v3666_v9 }
0x14d7   :  { %v4177_v16 = vpop.eup %4176 }
0x14d8   :  { %1606 = vrot.lane.b32.xlu0 %v4177_v16, %s4221_s29 }
0x14d9   :  { %v4179_v17 = vpop.eup %4178 }
0x14da   :  { %v1600_v18 = vadd.f32 1.0, %v4179_v17 }
0x14dc   :  { %4180 = vrcp.f32 %v1600_v18 }
0x14e6   :  { %v4181_v19 = vpop.eup %4180 }
0x14e7   :  { %v1604_v1 = vmul.f32 %v4181_v19, %v4551_v13 }
0x154a   :  { %v1607_v21 = vpop.permute.xlu0 %1606 }
0x154b   :  { %v1609_v22 = vmul.f32 %v4181_v19, %v1607_v21 }
0x154d   :  { %1611 = vrot.lane.b32.xlu1 %v1609_v22, %s4220_s4 }
0x159e   :  { %v1505_v25 = vpop.f32.mrb[12].mxu1 }
0x159f   :  { %v1506_v26 = vadd.f32 %v4667_v24, %v1505_v25  ;;  %v3879_v27 = vpop.f32.mrb[13].mxu1  ;;  %v2039_v25 = vld [vmem:[%s4932_s8] sm:$0x1] }
0x15a1   :  { %v1509_v28 = vmul.f32 %v1506_v26, %v4672_v42  ;;  %v4229_v26 = vmov 1  }
0x15a2   :  { %4101 = vset.pattern.permute.xlu1 %v4229_v26 }
0x15a3   :  { %v1511_v29 = vrot.slane %v1509_v28, 4 }
0x15a5   :  { %v1513_v30 = vadd.f32 %v1511_v29, %v1509_v28 }
0x15a7   :  { %1515 = vst.msk [vmem:[%s4943_s21] sm:$0xf] %vm1514_vm8, %v1513_v30 }
0x15bf   :  { %v1612_v33 = vpop.permute.xlu1 %1611 }
0x15c0   :  { %v1614_v34 = vadd.f32 %v1612_v33, %v1604_v1 }
0x15c2   :  { %4182 = vtanh.f32 %v1614_v34 }
0x15cc   :  { %v4183_v36 = vpop.eup %4182 }
0x15cd   :  { %1617 = vrot.lane.b32.xlu0 %v4183_v36, %s4223_s23 }
0x15d1   :  { %1699 = vperm.xlu0 %4099, %v1621_v37  }
0x163f   :  { %v1618_v38 = vpop.permute.xlu0 %1617 }
0x1640   :  { %v1620_v40 = vmul.f32 %v4181_v19, %v1618_v38 }
0x1642   :  { %1623 = vrot.lane.b32.xlu1 %v1620_v40, %s4225_s25 }
0x1650   :  { %v1700_v13 = vpop.permute.xlu0 %1699 }
0x1651   :  { %v1702_v44 = vmul.f32 %v1700_v13, %v4597_v39 }
0x1653   :  { %v1706_v47 = vrot.slane %v1702_v44, %v4599_v46 }
0x16b4   :  { %v1624_v41 = vpop.permute.xlu1 %1623 }
0x16b5   :  { %3890 = vmatmul.mubr.msk.f32.vlgmr.msra.gmra.mrb[14].mxu1 %vm124_vm0, %v1624_v41 }
0x16b6   :  { %3900 = vmatpush3.msra.mxu1 %v4616_v5  ;;  %3901 = vmatprep.mubr.msk.f32.mxu1 %vm4217_vm1, %v4216_v0 }
0x16b7   :  { %4051 = vmatprep.subr.bf16.mxu1 %v4218_v2 }
0x1788   :  { %v1693_v45 = vpop.f32.mrb[14].mxu1 }
0x1789   :  { %v1694_v12 = vadd.f32 %v1693_v45, %v4606_v50  ;;  %v3891_v15 = vpop.f32.mrb[15].mxu1 }
0x178b   :  { %v1707_v49 = vadd.f32 %v1706_v47, %v1694_v12 }
0x178d   :  { %v1708_v51 = vmax.f32 %v1707_v49, 0.0 }
0x178f   :  { %3897 = vmatmul.mubr.msk.f32.vlgmr.msra.gmra.mrb[16].mxu0 %vm203_vm2, %v1708_v51 }
0x1790   :  { %3905 = vmatpush3.msk.msra.mxu0 %vm1066_vm3, %v4642_v62  ;;  %3906 = vmatprep.mubr.msk.f32.mxu0 %vm4217_vm1, %v4216_v0 }
0x1791   :  { %3916 = vmatprep.subr.mxu0 %v4216_v0 }
0x1862   :  { %v1778_v52 = vpop.f32.mrb[16].mxu0 }
0x1863   :  { %v1779_v53 = vadd.f32 %v4623_v55, %v1778_v52  ;;  %v3898_v54 = vpop.f32.mrb[17].mxu0 }
0x1865   :  { %v1782_v56 = vmax.f32 %v1779_v53, 0.0 }
0x1867   :  { %3902 = vmatmul.mubr.msk.f32.vlgmr.msra.gmra.mrb[16].mxu1 %vm124_vm0, %v1782_v56 }
0x1868   :  { %4054 = vmatpush3.bf16.msk.msra.mxu1 %vm4512_vm5, %v4509_v31  ;;  %3913 = vmatprep.mubr.msk.f32.mxu1 %vm4217_vm1, %v4216_v0 }
0x1869   :  { %4055 = vmatprep.subr.bf16.mxu1 %v4218_v2 }
0x186b   :  { %3914 = vmatmul.mubr.msk.f32.vlgmr.msra.gmra.mrb[18].mxu1 %vm1078_vm7, %v1941_v57 }
0x186c   :  { %4057 = vmatpush3.bf16.msra.mxu1 %v4587_v35  ;;  %3925 = vmatprep.mubr.msk.f32.mxu1 %vm4217_vm1, %v4216_v0 }
0x186d   :  { %3933 = vmatprep.subr.mxu1 %v4216_v0 }
0x193a   :  { %v1852_v58 = vpop.f32.mrb[16].mxu1 }
0x193b   :  { %v4715_v59 = vadd.f32 %v4650_v63, %v1852_v58  ;;  %v3903_v23 = vpop.f32.mrb[17].mxu1 }
0x193d   :  { %v1856_v60 = vmax.f32 %v4715_v59, 0.0 }
0x193e   :  { %v2011_v61 = vpop.f32.mrb[18].mxu1 }
0x193f   :  { %v2012_v3 = vadd.f32 %v4539_v43, %v2011_v61  ;;  %3907 = vmatmul.mubr.msk.f32.vlgmr.msra.gmra.mrb[18].mxu0 %vm1070_vm6, %v1856_v60  ;;  %v3915_v4 = vpop.f32.mrb[19].mxu1 }
0x1940   :  { %3917 = vmatpush3.msra.mxu0 %v4571_v20  ;;  %3918 = vmatprep.mubr.msk.f32.mxu0 %vm4217_vm1, %v4216_v0 }
0x1941   :  { %4184 = vtanh.f32 %v2012_v3  ;;  %3928 = vmatprep.subr.mxu0 %v4216_v0  ;;  %v3674_v7 = vmul.f32 -1.442695, %v2012_v3 }
0x1943   :  { %4186 = vpow2.f32 %v3674_v7 }
0x194b   :  { %v4185_v6 = vpop.eup %4184 }
0x194c   :  { %2024 = vrot.lane.b32.xlu1 %v4185_v6, %s4221_s29 }
0x194d   :  { %v4187_v8 = vpop.eup %4186 }
0x194e   :  { %v2018_v10 = vadd.f32 1.0, %v4187_v8 }
0x1950   :  { %4188 = vrcp.f32 %v2018_v10 }
0x195a   :  { %v4189_v11 = vpop.eup %4188 }
0x195b   :  { %v2022_v18 = vmul.f32 0.0, %v4189_v11 }
0x19be   :  { %v2025_v14 = vpop.permute.xlu1 %2024 }
0x19bf   :  { %v2027_v16 = vmul.f32 %v4189_v11, %v2025_v14  ;;  %v2460_v14 = vld [vmem:[%s4932_s8 + $0x1] sm:$0x1] }
0x19c1   :  { %2029 = vrot.lane.b32.xlu0 %v2027_v16, %s4220_s4 }
0x1a12   :  { %v4726_v9 = vpop.f32.mrb[18].mxu0 }
0x1a13   :  { %v3908_v17 = vpop.f32.mrb[19].mxu0 }
0x1a33   :  { %v2030_v19 = vpop.permute.xlu0 %2029 }
0x1a34   :  { %v4728_v21 = vadd.f32 %v2030_v19, %v2022_v18 }
0x1a36   :  { %4190 = vtanh.f32 %v4728_v21 }
0x1a40   :  { %v4191_v22 = vpop.eup %4190 }
0x1a41   :  { %2035 = vrot.lane.b32.xlu1 %v4191_v22, %s4223_s23 }
0x1a45   :  { %2117 = vperm.xlu1 %4101, %v2039_v25  }
0x1ab3   :  { %v2036_v27 = vpop.permute.xlu1 %2035 }
0x1ab4   :  { %v2038_v28 = vmul.f32 %v4189_v11, %v2036_v27 }
0x1ab6   :  { %2041 = vrot.lane.b32.xlu0 %v2038_v28, %s4225_s25 }
0x1aba   :  { %2359 = vrot.lane.b32.xlu0 %v2038_v28, %s4228_s1 }
0x1ac4   :  { %v2118_v30 = vpop.permute.xlu1 %2117 }
0x1ac5   :  { %v2120_v1 = vmul.f32 %v2118_v30, %v4597_v39 }
0x1ac7   :  { %v2124_v33 = vrot.slane %v2120_v1, %v4599_v46 }
0x1b28   :  { %v2042_v29 = vpop.permute.xlu0 %2041 }
0x1b29   :  { %3919 = vmatmul.mubr.msk.f32.vlgmr.msra.gmra.mrb[20].mxu0 %vm124_vm0, %v2042_v29 }
0x1b2a   :  { %3929 = vmatpush3.msra.mxu0 %v4616_v5  ;;  %3930 = vmatprep.mubr.msk.f32.mxu0 %vm4217_vm1, %v4216_v0 }
0x1b2b   :  { %4058 = vmatprep.subr.bf16.mxu0 %v4218_v2 }
0x1b2c   :  { %v2360_v47 = vpop.permute.xlu0 %2359 }
0x1b2d   :  { %v2362_v12 = vsel %vm1070_vm6, %v4715_v59, %v2360_v47 }
0x1bfc   :  { %v2111_v34 = vpop.f32.mrb[20].mxu0 }
0x1bfd   :  { %v2112_v36 = vadd.f32 %v2111_v34, %v4603_v48  ;;  %v3920_v37 = vpop.f32.mrb[21].mxu0 }
0x1bff   :  { %v2125_v38 = vadd.f32 %v2124_v33, %v2112_v36 }
0x1c01   :  { %v2126_v40 = vmax.f32 %v2125_v38, 0.0 }
0x1c03   :  { %3926 = vmatmul.mubr.msk.f32.vlgmr.msra.gmra.mrb[20].mxu1 %vm203_vm2, %v2126_v40 }
0x1c04   :  { %3934 = vmatpush3.msk.msra.mxu1 %vm1066_vm3, %v4642_v62  ;;  %3935 = vmatprep.mubr.msk.f32.mxu1 %vm4217_vm1, %v4216_v0 }
0x1c05   :  { %3945 = vmatprep.subr.mxu1 %v4216_v0 }
0x1cd6   :  { %v2196_v41 = vpop.f32.mrb[20].mxu1 }
0x1cd7   :  { %v2197_v13 = vadd.f32 %v4623_v55, %v2196_v41  ;;  %v3927_v44 = vpop.f32.mrb[21].mxu1 }
0x1cd9   :  { %v2200_v45 = vmax.f32 %v2197_v13, 0.0 }
0x1cdb   :  { %3931 = vmatmul.mubr.msk.f32.vlgmr.msra.gmra.mrb[22].mxu0 %vm124_vm0, %v2200_v45 }
0x1cdc   :  { %4061 = vmatpush3.bf16.msk.msra.mxu0 %vm4512_vm5, %v4509_v31  ;;  %3942 = vmatprep.mubr.msk.f32.mxu0 %vm4217_vm1, %v4216_v0 }
0x1cdd   :  { %4062 = vmatprep.subr.bf16.mxu0 %v4218_v2 }
0x1cdf   :  { %3943 = vmatmul.mubr.msk.f32.vlgmr.msra.gmra.mrb[24].mxu0 %vm1078_vm7, %v2362_v12 }
0x1ce0   :  { %4064 = vmatpush3.bf16.msra.mxu0 %v4587_v35  ;;  %3954 = vmatprep.mubr.msk.f32.mxu0 %vm4217_vm1, %v4216_v0 }
0x1ce1   :  { %3962 = vmatprep.subr.mxu0 %v4216_v0 }
0x1dae   :  { %v2270_v15 = vpop.f32.mrb[22].mxu0 }
0x1daf   :  { %v2271_v49 = vadd.f32 %v4650_v63, %v2270_v15  ;;  %v3932_v51 = vpop.f32.mrb[23].mxu0 }
0x1db1   :  { %v2274_v52 = vmax.f32 %v2271_v49, 0.0  ;;  %v2780_v36 = vsel %vm1070_vm6, %v2271_v49, 0.0 }
0x1db2   :  { %v2432_v53 = vpop.f32.mrb[24].mxu0 }
0x1db3   :  { %v2433_v54 = vadd.f32 %v4539_v43, %v2432_v53  ;;  %3936 = vmatmul.mubr.msk.f32.vlgmr.msra.gmra.mrb[22].mxu1 %vm1070_vm6, %v2274_v52  ;;  %v3944_v56 = vpop.f32.mrb[25].mxu0 }
0x1db4   :  { %3946 = vmatpush3.msra.mxu1 %v4571_v20  ;;  %3947 = vmatprep.mubr.msk.f32.mxu1 %vm4217_vm1, %v4216_v0 }
0x1db5   :  { %4192 = vtanh.f32 %v2433_v54  ;;  %3957 = vmatprep.subr.mxu1 %v4216_v0  ;;  %v3682_v58 = vmul.f32 -1.442695, %v2433_v54 }
0x1db7   :  { %4194 = vpow2.f32 %v3682_v58 }
0x1dbf   :  { %v4193_v57 = vpop.eup %4192 }
0x1dc0   :  { %2445 = vrot.lane.b32.xlu1 %v4193_v57, %s4221_s29 }
0x1dc1   :  { %v4195_v59 = vpop.eup %4194 }
0x1dc2   :  { %v2439_v23 = vadd.f32 1.0, %v4195_v59 }
0x1dc4   :  { %4196 = vrcp.f32 %v2439_v23 }
0x1dce   :  { %v4197_v60 = vpop.eup %4196 }
0x1dcf   :  { %v2443_v7 = vmul.f32 %v4197_v60, %v4728_v21 }
0x1e32   :  { %v2446_v61 = vpop.permute.xlu1 %2445 }
0x1e33   :  { %v2448_v3 = vmul.f32 %v4197_v60, %v2446_v61  ;;  %v4230_v61 = vmov 2  }
0x1e34   :  { %4102 = vset.pattern.permute.xlu0 %v4230_v61 }
0x1e35   :  { %2450 = vrot.lane.b32.xlu0 %v2448_v3, %s4220_s4 }
0x1e86   :  { %v4775_v4 = vpop.f32.mrb[22].mxu1 }
0x1e87   :  { %v3937_v6 = vpop.f32.mrb[23].mxu1 }
0x1ea7   :  { %v2451_v8 = vpop.permute.xlu0 %2450 }
0x1ea8   :  { %v2453_v10 = vadd.f32 %v2451_v8, %v2443_v7 }
0x1eaa   :  { %4198 = vtanh.f32 %v2453_v10 }
0x1eb4   :  { %v4199_v11 = vpop.eup %4198 }
0x1eb5   :  { %2456 = vrot.lane.b32.xlu1 %v4199_v11, %s4223_s23 }
0x1eb9   :  { %2538 = vperm.xlu1 %4101, %v2460_v14  }
0x1ebd   :  { %4103 = vset.pattern.permute.xlu1 %v4230_v61 }
0x1f27   :  { %v2457_v16 = vpop.permute.xlu1 %2456 }
0x1f28   :  { %v2459_v17 = vmul.f32 %v4197_v60, %v2457_v16  ;;  %v2878_v60 = vld [vmem:[%s4932_s8] sm:$0x1] }
0x1f2a   :  { %2462 = vrot.lane.b32.xlu0 %v2459_v17, %s4225_s25 }
0x1f38   :  { %v2539_v19 = vpop.permute.xlu1 %2538 }
0x1f39   :  { %v2541_v21 = vmul.f32 %v2539_v19, %v4597_v39 }
0x1f3b   :  { %v2545_v25 = vrot.slane %v2541_v21, %v4599_v46 }
0x1f9c   :  { %v2463_v18 = vpop.permute.xlu0 %2462 }
0x1f9d   :  { %3948 = vmatmul.mubr.msk.f32.vlgmr.msra.gmra.mrb[24].mxu1 %vm124_vm0, %v2463_v18 }
0x1f9e   :  { %3958 = vmatpush3.msra.mxu1 %v4616_v5  ;;  %3959 = vmatprep.mubr.msk.f32.mxu1 %vm4217_vm1, %v4216_v0 }
0x1f9f   :  { %4065 = vmatprep.subr.bf16.mxu1 %v4218_v2 }
0x2070   :  { %v2532_v22 = vpop.f32.mrb[24].mxu1 }
0x2071   :  { %v2533_v26 = vadd.f32 %v2532_v22, %v4606_v50  ;;  %v3949_v27 = vpop.f32.mrb[25].mxu1 }
0x2073   :  { %v2546_v28 = vadd.f32 %v2545_v25, %v2533_v26 }
0x2075   :  { %v2547_v29 = vmax.f32 %v2546_v28, 0.0 }
0x2077   :  { %3955 = vmatmul.mubr.msk.f32.vlgmr.msra.gmra.mrb[26].mxu0 %vm203_vm2, %v2547_v29 }
0x2078   :  { %3963 = vmatpush3.msk.msra.mxu0 %vm1066_vm3, %v4642_v62  ;;  %3964 = vmatprep.mubr.msk.f32.mxu0 %vm4217_vm1, %v4216_v0 }
0x2079   :  { %3974 = vmatprep.subr.mxu0 %v4216_v0 }
0x214a   :  { %v2617_v30 = vpop.f32.mrb[26].mxu0 }
0x214b   :  { %v2618_v1 = vadd.f32 %v4623_v55, %v2617_v30  ;;  %v3956_v33 = vpop.f32.mrb[27].mxu0 }
0x214d   :  { %v2621_v34 = vmax.f32 %v2618_v1, 0.0 }
0x214f   :  { %3960 = vmatmul.mubr.msk.f32.vlgmr.msra.gmra.mrb[26].mxu1 %vm124_vm0, %v2621_v34 }
0x2150   :  { %4068 = vmatpush3.bf16.msk.msra.mxu1 %vm4512_vm5, %v4509_v31  ;;  %3971 = vmatprep.mubr.msk.f32.mxu1 %vm4217_vm1, %v4216_v0 }
0x2151   :  { %4069 = vmatprep.subr.bf16.mxu1 %v4218_v2 }
0x2153   :  { %3972 = vmatmul.mubr.msk.f32.vlgmr.msra.gmra.mrb[28].mxu1 %vm1078_vm7, %v2780_v36 }
0x2154   :  { %4071 = vmatpush3.bf16.msra.mxu1 %v4587_v35  ;;  %3983 = vmatprep.mubr.msk.f32.mxu1 %vm4217_vm1, %v4216_v0 }
0x2155   :  { %3991 = vmatprep.subr.mxu1 %v4216_v0 }
0x2222   :  { %v2691_v37 = vpop.f32.mrb[26].mxu1 }
0x2223   :  { %v4812_v38 = vadd.f32 %v4650_v63, %v2691_v37  ;;  %v3961_v40 = vpop.f32.mrb[27].mxu1 }
0x2225   :  { %v2695_v41 = vmax.f32 %v4812_v38, 0.0 }
0x2226   :  { %v2850_v13 = vpop.f32.mrb[28].mxu1 }
0x2227   :  { %v2851_v44 = vadd.f32 %v4539_v43, %v2850_v13  ;;  %3965 = vmatmul.mubr.msk.f32.vlgmr.msra.gmra.mrb[28].mxu0 %vm1070_vm6, %v2695_v41  ;;  %v3973_v45 = vpop.f32.mrb[29].mxu1 }
0x2228   :  { %3975 = vmatpush3.msra.mxu0 %v4571_v20  ;;  %3976 = vmatprep.mubr.msk.f32.mxu0 %vm4217_vm1, %v4216_v0  ;;  %v2345_v45 = vadd.f32 %v4667_v24, %v4775_v4 }
0x2229   :  { %4200 = vtanh.f32 %v2851_v44  ;;  %3986 = vmatprep.subr.mxu0 %v4216_v0  ;;  %v3690_v12 = vmul.f32 -1.442695, %v2851_v44 }
0x222b   :  { %4202 = vpow2.f32 %v3690_v12 }
0x2233   :  { %v4201_v47 = vpop.eup %4200 }
0x2234   :  { %2863 = vrot.lane.b32.xlu0 %v4201_v47, %s4221_s29  ;;  %v2348_v47 = vmul.f32 %v2345_v45, %v4672_v42 }
0x2235   :  { %v4203_v15 = vpop.eup %4202 }
0x2236   :  { %v2857_v49 = vadd.f32 1.0, %v4203_v15 }
0x2238   :  { %4204 = vrcp.f32 %v2857_v49  ;;  %v3299_v49 = vld [vmem:[%s4932_s8 + $0x1] sm:$0x1]  ;;  %s4233_s8 = smov 3  }
0x2242   :  { %v4205_v51 = vpop.eup %4204 }
0x2243   :  { %v2861_v57 = vmul.f32 0.0, %v4205_v51 }
0x22a6   :  { %v2864_v52 = vpop.permute.xlu0 %2863 }
0x22a7   :  { %v2866_v53 = vmul.f32 %v4205_v51, %v2864_v52 }
0x22a9   :  { %2868 = vrot.lane.b32.xlu1 %v2866_v53, %s4220_s4 }
0x22fa   :  { %v4823_v54 = vpop.f32.mrb[28].mxu0 }
0x22fb   :  { %v3966_v56 = vpop.f32.mrb[29].mxu0 }
0x231b   :  { %v2869_v58 = vpop.permute.xlu1 %2868 }
0x231c   :  { %v4825_v59 = vadd.f32 %v2869_v58, %v2861_v57  ;;  %v1927_v57 = vadd.f32 %v4667_v24, %v4726_v9 }
0x231e   :  { %4206 = vtanh.f32 %v4825_v59  ;;  %v1930_v58 = vmul.f32 %v1927_v57, %v4672_v42 }
0x2328   :  { %v4207_v23 = vpop.eup %4206 }
0x2329   :  { %2874 = vrot.lane.b32.xlu0 %v4207_v23, %s4223_s23 }
0x232d   :  { %2956 = vperm.xlu0 %4102, %v2878_v60   ;;  %v1932_v60 = vrot.slane %v1930_v58, 4 }
0x239b   :  { %v2875_v3 = vpop.permute.xlu0 %2874 }
0x239c   :  { %v2877_v6 = vmul.f32 %v4205_v51, %v2875_v3  ;;  %v2350_v51 = vrot.slane %v2348_v47, 4 }
0x239e   :  { %2880 = vrot.lane.b32.xlu1 %v2877_v6, %s4225_s25  ;;  %v2352_v56 = vadd.f32 %v2350_v51, %v2348_v47 }
0x23a2   :  { %3198 = vrot.lane.b32.xlu1 %v2877_v6, %s4228_s1 }
0x23ac   :  { %v2957_v8 = vpop.permute.xlu0 %2956 }
0x23ad   :  { %v2959_v10 = vmul.f32 %v2957_v8, %v4597_v39 }
0x23af   :  { %v2963_v11 = vrot.slane %v2959_v10, %v4599_v46 }
0x2410   :  { %v2881_v7 = vpop.permute.xlu1 %2880 }
0x2411   :  { %3977 = vmatmul.mubr.msk.f32.vlgmr.msra.gmra.mrb[30].mxu0 %vm124_vm0, %v2881_v7  ;;  %v1934_v7 = vadd.f32 %v1932_v60, %v1930_v58 }
0x2412   :  { %3987 = vmatpush3.msra.mxu0 %v4616_v5  ;;  %3988 = vmatprep.mubr.msk.f32.mxu0 %vm4217_vm1, %v4216_v0 }
0x2413   :  { %4072 = vmatprep.subr.bf16.mxu0 %v4218_v2 }
0x2414   :  { %v3199_v27 = vpop.permute.xlu1 %3198 }
0x24e4   :  { %v2950_v14 = vpop.f32.mrb[30].mxu0 }
0x24e5   :  { %v2951_v16 = vadd.f32 %v2950_v14, %v4603_v48  ;;  %v3978_v17 = vpop.f32.mrb[31].mxu0  ;;  %v3201_v48 = vsel %vm1070_vm6, %v4812_v38, %v3199_v27 }
0x24e7   :  { %v2964_v18 = vadd.f32 %v2963_v11, %v2951_v16 }
0x24e9   :  { %v2965_v19 = vmax.f32 %v2964_v18, 0.0 }
0x24eb   :  { %3984 = vmatmul.mubr.msk.f32.vlgmr.msra.gmra.mrb[30].mxu1 %vm203_vm2, %v2965_v19 }
0x24ec   :  { %3992 = vmatpush3.msk.msra.mxu1 %vm1066_vm3, %v4642_v62  ;;  %3993 = vmatprep.mubr.msk.f32.mxu1 %vm4217_vm1, %v4216_v0 }
0x24ed   :  { %4003 = vmatprep.subr.mxu1 %v4216_v0 }
0x25be   :  { %v3035_v21 = vpop.f32.mrb[30].mxu1 }
0x25bf   :  { %v3036_v22 = vadd.f32 %v4623_v55, %v3035_v21  ;;  %v3985_v25 = vpop.f32.mrb[31].mxu1 }
0x25c1   :  { %v3039_v26 = vmax.f32 %v3036_v22, 0.0 }
0x25c3   :  { %3989 = vmatmul.mubr.msk.f32.vlgmr.msra.gmra.mrb[32].mxu0 %vm124_vm0, %v3039_v26 }
0x25c4   :  { %4075 = vmatpush3.bf16.msk.msra.mxu0 %vm4512_vm5, %v4509_v31  ;;  %4000 = vmatprep.mubr.msk.f32.mxu0 %vm4217_vm1, %v4216_v0 }
0x25c5   :  { %4076 = vmatprep.subr.bf16.mxu0 %v4218_v2 }
0x25c7   :  { %4001 = vmatmul.mubr.msk.f32.vlgmr.msra.gmra.mrb[34].mxu0 %vm1078_vm7, %v3201_v48 }
0x25c8   :  { %4078 = vmatpush3.bf16.msra.mxu0 %v4587_v35  ;;  %4012 = vmatprep.mubr.msk.f32.mxu0 %vm4217_vm1, %v4216_v0 }
0x25c9   :  { %4020 = vmatprep.subr.mxu0 %v4216_v0 }
0x2696   :  { %v3109_v28 = vpop.f32.mrb[32].mxu0 }
0x2697   :  { %v3110_v31 = vadd.f32 %v4650_v63, %v3109_v28  ;;  %v3990_v32 = vpop.f32.mrb[33].mxu0 }
0x2699   :  { %v3113_v29 = vmax.f32 %v3110_v31, 0.0 }
0x269a   :  { %v3271_v30 = vpop.f32.mrb[34].mxu0 }
0x269b   :  { %v3272_v2 = vadd.f32 %v4539_v43, %v3271_v30  ;;  %3994 = vmatmul.mubr.msk.f32.vlgmr.msra.gmra.mrb[32].mxu1 %vm1070_vm6, %v3113_v29  ;;  %v4002_v1 = vpop.f32.mrb[35].mxu0 }
0x269c   :  { %4004 = vmatpush3.msra.mxu1 %v4571_v20  ;;  %4005 = vmatprep.mubr.msk.f32.mxu1 %vm4217_vm1, %v4216_v0 }
0x269d   :  { %4208 = vtanh.f32 %v3272_v2  ;;  %4015 = vmatprep.subr.mxu1 %v4216_v0  ;;  %v3698_v33 = vmul.f32 -1.442695, %v3272_v2 }
0x269f   :  { %4210 = vpow2.f32 %v3698_v33 }
0x26a7   :  { %v4209_v35 = vpop.eup %4208 }
0x26a8   :  { %3284 = vrot.lane.b32.xlu1 %v4209_v35, %s4221_s29 }
0x26a9   :  { %v4211_v34 = vpop.eup %4210 }
0x26aa   :  { %v3278_v36 = vadd.f32 1.0, %v4211_v34 }
0x26ac   :  { %4212 = vrcp.f32 %v3278_v36 }
0x26b6   :  { %v4213_v43 = vpop.eup %4212 }
0x26b7   :  { %v3282_v41 = vmul.f32 %v4213_v43, %v4825_v59  ;;  %v2766_v59 = vadd.f32 %v4667_v24, %v4823_v54 }
0x26b9   :  { %v2769_v61 = vmul.f32 %v2766_v59, %v4672_v42 }
0x26bb   :  { %v2771_v6 = vrot.slane %v2769_v61, 4 }
0x26bd   :  { %v2773_v8 = vadd.f32 %v2771_v6, %v2769_v61 }
0x271a   :  { %v3285_v37 = vpop.permute.xlu1 %3284 }
0x271b   :  { %v3287_v38 = vmul.f32 %v4213_v43, %v3285_v37 }
0x271d   :  { %3289 = vrot.lane.b32.xlu0 %v3287_v38, %s4220_s4  ;;  %s4231_s4 = smov 1  }
0x276e   :  { %v3183_v20 = vpop.f32.mrb[32].mxu1 }
0x276f   :  { %v3995_v40 = vpop.f32.mrb[33].mxu1  ;;  %v3184_v12 = vadd.f32 %v4667_v24, %v3183_v20 }
0x2771   :  { %v3187_v52 = vmul.f32 %v3184_v12, %v4672_v42 }
0x2773   :  { %v3189_v53 = vrot.slane %v3187_v52, 4 }
0x2775   :  { %v3191_v4 = vadd.f32 %v3189_v53, %v3187_v52 }
0x278f   :  { %v3290_v13 = vpop.permute.xlu0 %3289 }
0x2790   :  { %v3292_v44 = vadd.f32 %v3290_v13, %v3282_v41 }
0x2792   :  { %4214 = vtanh.f32 %v3292_v44 }
0x279c   :  { %v4215_v15 = vpop.eup %4214 }
0x279d   :  { %3295 = vrot.lane.b32.xlu1 %v4215_v15, %s4223_s23  ;;  %s4234_s23 = smov 4  }
0x27a1   :  { %3377 = vperm.xlu1 %4103, %v3299_v49  }
0x27a5   :  { %2354 = vrot.lane.b32.xlu1 %v2352_v56, %s4231_s4 }
0x27a9   :  { %3193 = vrot.lane.b32.xlu1 %v3191_v4, %s4232_s6 }
0x280f   :  { %v3296_v23 = vpop.permute.xlu1 %3295 }
0x2810   :  { %v3298_v3 = vmul.f32 %v4213_v43, %v3296_v23 }
0x2812   :  { %3301 = vrot.lane.b32.xlu0 %v3298_v3, %s4225_s25 }
0x2816   :  { %1936 = vrot.lane.b32.xlu0 %v1934_v7, %s4233_s8 }
0x281a   :  { %2775 = vrot.lane.b32.xlu0 %v2773_v8, %s4234_s23 }
0x2820   :  { %v3378_v9 = vpop.permute.xlu1 %3377 }
0x2824   :  { %v2355_v54 = vpop.permute.xlu1 %2354 }
0x2828   :  { %v3194_v16 = vpop.permute.xlu1 %3193 }
0x2884   :  { %v3302_v10 = vpop.permute.xlu0 %3301 }
0x2885   :  { %4006 = vmatmul.mubr.msk.f32.vlgmr.msra.gmra.mrb[34].mxu1 %vm124_vm0, %v3302_v10 }
0x2886   :  { %4016 = vmatpush3.msra.mxu1 %v4616_v5  ;;  %4017 = vmatprep.mubr.msk.f32.mxu1 %vm4217_vm1, %v4216_v0  ;;  %v3380_v5 = vmul.f32 %v3378_v9, %v4597_v39 }
0x2888   :  { %v1937_v11 = vpop.permute.xlu0 %1936  ;;  %v3384_v17 = vrot.slane %v3380_v5, %v4599_v46 }
0x2889   :  { %1940 = vst.msk [vmem:[%s4943_s21] sm:$0xf] %vm1939_vm9, %v1937_v11 }
0x288a   :  { %2358 = vst.msk [vmem:[%s4943_s21] sm:$0xf] %vm2357_vm10, %v2355_v54 }
0x288c   :  { %v2776_v14 = vpop.permute.xlu0 %2775 }
0x288d   :  { %2779 = vst.msk [vmem:[%s4943_s21] sm:$0xf] %vm2778_vm11, %v2776_v14 }
0x288e   :  { %3197 = vst.msk [vmem:[%s4943_s21] sm:$0xf] %vm3196_vm12, %v3194_v16 }
0x2958   :  { %v3371_v18 = vpop.f32.mrb[34].mxu1 }
0x2959   :  { %v3372_v19 = vadd.f32 %v3371_v18, %v4606_v50  ;;  %v4007_v21 = vpop.f32.mrb[35].mxu1 }
0x295b   :  { %v3385_v22 = vadd.f32 %v3384_v17, %v3372_v19 }
0x295d   :  { %v3386_v25 = vmax.f32 %v3385_v22, 0.0 }
0x295f   :  { %4013 = vmatmul.mubr.msk.f32.vlgmr.msra.gmra.mrb[36].mxu0 %vm203_vm2, %v3386_v25 }
0x2960   :  { %4021 = vmatpush3.msk.msra.mxu0 %vm1066_vm3, %v4642_v62  ;;  %4022 = vmatprep.mubr.msk.f32.mxu0 %vm4217_vm1, %v4216_v0 }
0x2a32   :  { %v3456_v26 = vpop.f32.mrb[36].mxu0 }
0x2a33   :  { %v3457_v27 = vadd.f32 %v4623_v55, %v3456_v26  ;;  %v4014_v39 = vpop.f32.mrb[37].mxu0 }
0x2a35   :  { %v3460_v48 = vmax.f32 %v3457_v27, 0.0 }
0x2a37   :  { %4018 = vmatmul.mubr.msk.f32.vlgmr.msra.gmra.mrb[36].mxu1 %vm124_vm0, %v3460_v48 }
0x2b0a   :  { %v3530_v46 = vpop.f32.mrb[36].mxu1 }
0x2b0b   :  { %v3531_v50 = vadd.f32 %v4650_v63, %v3530_v46  ;;  %v4019_v28 = vpop.f32.mrb[37].mxu1 }
0x2b0d   :  { %v3534_v31 = vmax.f32 %v3531_v50, 0.0 }
0x2b0f   :  { %4023 = vmatmul.mubr.msk.f32.vlgmr.msra.gmra.mrb[38].mxu0 %vm1070_vm6, %v3534_v31 }
0x2be2   :  { %v3604_v32 = vpop.f32.mrb[38].mxu0 }
0x2be3   :  { %v3605_v62 = vadd.f32 %v4667_v24, %v3604_v32  ;;  %v4024_v29 = vpop.f32.mrb[39].mxu0 }
0x2be5   :  { %v3608_v0 = vmul.f32 %v3605_v62, %v4672_v42 }
0x2be7   :  { %v3610_v30 = vrot.slane %v3608_v0, 4 }
0x2be9   :  { %v3612_v2 = vadd.f32 %v3610_v30, %v3608_v0 }
0x2beb   :  { %3614 = vrot.lane.b32.xlu0 %v3612_v2, %s4235_s28 }
0x2c5d   :  { %v3615_v55 = vpop.permute.xlu0 %3614 }
0x2c5e   :  { %3618 = vst.msk [vmem:[%s4943_s21] sm:$0xf] %vm3617_vm13, %v3615_v55 }

</bundles_post_ra>
